<compile_context>
chip_gen: v5e
topology: v5e:2x2
jax: 0.10.0
libtpu: 0.0.40
codegen_flags: <defaults>
</compile_context>

<pallas_src>
import functools

import jax
import jax.numpy as jnp
from jax import lax
from jax.experimental import pallas as pl
from jax.experimental.pallas import tpu as pltpu


def _fv_sample_kernel(coords_ref, fmt_ref, out_ref, *, D, C):
    """coords_ref: (3, TN) f32; fmt_ref: (2*8*C, V_pad) bf16 (hi rows, then lo rows);
    out_ref: (C, TN) f32."""
    TN = out_ref.shape[1]
    V_pad = fmt_ref.shape[1]
    G = 8 * C

    c = coords_ref[...]                                        # (3, TN)
    scale = (D - 1) * 0.5
    # align_corners=True unnormalize + padding_mode='border' coordinate clamp.
    pos = jnp.clip((c + 1.0) * scale, 0.0, float(D - 1))       # (3, TN) f32
    p0f = jnp.floor(pos)
    w = pos - p0f                                              # fractional weights, f32
    p0 = p0f.astype(jnp.int32)

    x0 = p0[0:1, :]
    y0 = p0[1:2, :]
    z0 = p0[2:3, :]
    wx = w[0:1, :]
    wy = w[1:2, :]
    wz = w[2:3, :]

    # Flat index of the (x0, y0, z0) base corner; the other 7 corners are picked
    # up by the shift-packed feature table, so only ONE one-hot is needed.
    idx000 = z0 * (D * D) + y0 * D + x0                        # (1, TN) int32

    # Transposed one-hot (V_pad, TN), built directly in bf16 (exact values).
    row = lax.broadcasted_iota(jnp.int32, (V_pad, TN), 0)
    onehot = jnp.where(row == idx000, 1.0, 0.0).astype(jnp.bfloat16)   # (V_pad, TN)

    # One bf16 MXU matmul gathers all 8 corner feature vectors per point.
    # Rows 0:G of fmt are the bf16-hi table, rows G:2G the bf16 residual; summing
    # the two halves in f32 recovers near-f32 feature values.
    g2 = jnp.dot(fmt_ref[...], onehot, preferred_element_type=jnp.float32)  # (2G, TN)
    g = g2[0:G, :] + g2[G:2 * G, :]                            # (G, TN) f32

    # Trilinear blend, fully lane-dense: corner k occupies rows k*C:(k+1)*C.
    # Shifted corners that carry past a row/slab boundary (or into zero padding)
    # always have an exactly-zero weight because of the border clamp, so the
    # packed gather is exact.
    ox = 1.0 - wx
    oy = 1.0 - wy
    oz = 1.0 - wz
    out = None
    k = 0
    for dz in (0, 1):
        fz = wz if dz else oz
        for dy in (0, 1):
            fy = wy if dy else oy
            for dx in (0, 1):
                fx = wx if dx else ox
                wk = fz * fy * fx                              # (1, TN) f32
                term = wk * g[k * C:(k + 1) * C, :]            # (C, TN)
                out = term if out is None else out + term
                k += 1
    out_ref[...] = out


def pack_feature_volume(fm):
    """(1, C, D, D, D) parameter -> shift-packed (2*8*C, V_pad) bf16 table.

    Row block k (k enumerating (dz, dy, dx) in lex order) of the "hi" half holds
    the flattened volume (flat index = z*D*D + y*D + x) shifted by
    off_k = dz*D*D + dy*D + dx and zero-padded; the second half holds the bf16
    residual (fm - bf16(fm)) with the same layout, so one bf16 one-hot column at
    idx000 gathers all 8 corners with near-f32 accuracy.
    Plain jnp: hoist / constant-fold per parameter update.
    """
    C, D = fm.shape[1], fm.shape[2]
    V = D ** 3
    V_pad = pl.cdiv(V, 128) * 128                       # lane-align contraction dim
    max_off = D * D + D + 1
    # (1, C, D, D, D) -> (C, V), flat index = z*D*D + y*D + x.
    fm_flat = jnp.reshape(fm[0].astype(jnp.float32), (C, V))
    fm_zp = jnp.pad(fm_flat, ((0, 0), (0, V_pad + max_off - V)))
    blocks = []
    for dz in (0, 1):
        for dy in (0, 1):
            for dx in (0, 1):
                off = dz * D * D + dy * D + dx
                blocks.append(fm_zp[:, off:off + V_pad])       # (C, V_pad)
    fmt = jnp.concatenate(blocks, axis=0)                      # (8C, V_pad) f32
    hi = fmt.astype(jnp.bfloat16)
    lo = (fmt - hi.astype(jnp.float32)).astype(jnp.bfloat16)
    return jnp.concatenate([hi, lo], axis=0)                   # (16C, V_pad) bf16


def feature_volume_forward(x, fm, *, globalFeats=False, tn=512, fm_packed=None):
    """Pallas equivalent of FeatureVolume.forward.

    x : (N, 3) or (N, M, 3) float coords in [-1, 1]
    fm: (1, C, D, D, D) feature volume (the nn.Parameter), D = fsize + 1
    tn: query-point tile (multiple of 128; 512/1024 recommended).
    fm_packed: optional pre-packed table from pack_feature_volume(fm).
    """
    orig_shape = x.shape
    first_branch = (x.ndim == 2 and x.shape[1] == 3)
    pts = jnp.reshape(x, (-1, 3)).astype(jnp.float32)

    C, D = fm.shape[1], fm.shape[2]
    if fm_packed is None:
        fm_packed = pack_feature_volume(fm)
    V_pad = fm_packed.shape[1]
    G2 = fm_packed.shape[0]

    N = pts.shape[0]
    tn = max(128, pl.cdiv(tn, 128) * 128)
    # Keep >= 2 grid steps when possible so v7x's two TensorCores both get work
    # (the "parallel" grid axis is sharded across cores).
    half = pl.cdiv(pl.cdiv(N, 2), 128) * 128
    tn_eff = min(tn, max(128, half))
    N_pad = pl.cdiv(N, tn_eff) * tn_eff

    # Lane-dense coords layout: (3, N_pad).  Wrapper-side transpose is layout
    # plumbing only.
    pts_t = jnp.transpose(jnp.pad(pts, ((0, N_pad - N), (0, 0))))

    kernel = functools.partial(_fv_sample_kernel, D=D, C=C)
    out_t = pl.pallas_call(
        kernel,
        out_shape=jax.ShapeDtypeStruct((C, N_pad), jnp.float32),
        grid_spec=pltpu.PrefetchScalarGridSpec(
            num_scalar_prefetch=0,
            grid=(N_pad // tn_eff,),
            in_specs=[
                pl.BlockSpec((3, tn_eff), lambda i: (0, i)),       # coords tile (lane-dense)
                pl.BlockSpec((G2, V_pad), lambda i: (0, 0)),       # packed volume, resident
            ],
            out_specs=pl.BlockSpec((C, tn_eff), lambda i: (0, i)),  # lane-dense output
        ),
        compiler_params=pltpu.CompilerParams(
            dimension_semantics=("parallel",)),
    )(pts_t, fm_packed)

    sample = jnp.transpose(out_t)[:N]                              # (N, C)
    if not first_branch:
        sample = sample.reshape(orig_shape[0], orig_shape[1], C)

    if globalFeats:
        # Mirrors the torch code exactly (indexes axis 1 in both branches).
        globVal = sample[:, -1]
        sample = sample[:, :-1]
        return globVal, sample
    return sample


def _grid_sample_ref(fm, pts):
    """Pure-JAX trilinear grid_sample (align_corners=True, border) for checking."""
    C, D = fm.shape[1], fm.shape[2]
    vol = fm[0]  # (C, D, D, D)
    scale = (D - 1) * 0.5
    ix = jnp.clip((pts[:, 0] + 1.0) * scale, 0.0, D - 1.0)
    iy = jnp.clip((pts[:, 1] + 1.0) * scale, 0.0, D - 1.0)
    iz = jnp.clip((pts[:, 2] + 1.0) * scale, 0.0, D - 1.0)
    x0 = jnp.floor(ix).astype(jnp.int32); x1 = jnp.minimum(x0 + 1, D - 1)
    y0 = jnp.floor(iy).astype(jnp.int32); y1 = jnp.minimum(y0 + 1, D - 1)
    z0 = jnp.floor(iz).astype(jnp.int32); z1 = jnp.minimum(z0 + 1, D - 1)
    wx = ix - x0; wy = iy - y0; wz = iz - z0

    def g(zc, yc, xc):
        return vol[:, zc, yc, xc]  # (C, N)

    out = (g(z0, y0, x0) * (1 - wx) * (1 - wy) * (1 - wz)
           + g(z0, y0, x1) * wx * (1 - wy) * (1 - wz)
           + g(z0, y1, x0) * (1 - wx) * wy * (1 - wz)
           + g(z0, y1, x1) * wx * wy * (1 - wz)
           + g(z1, y0, x0) * (1 - wx) * (1 - wy) * wz
           + g(z1, y0, x1) * wx * (1 - wy) * wz
           + g(z1, y1, x0) * (1 - wx) * wy * wz
           + g(z1, y1, x1) * wx * wy * wz)
    return out.T  # (N, C)


if __name__ == "__main__":
    key = jax.random.PRNGKey(0)
    k_fm, k_x, k_x2 = jax.random.split(key, 3)

    # Module config: FeatureVolume(fdim=16, fsize=8, indim=3, tvlsqrt=False)
    fdim, fsize = 16, 8
    D = fsize + 1
    # Deterministic synthetic parameter, matching torch.randn(...) * 0.01 shape.
    fm = jax.random.normal(k_fm, (1, fdim, D, D, D), jnp.float32) * 0.01

    N = 100
    # Range slightly beyond [-1, 1] to exercise border clamping.
    x = jax.random.uniform(k_x, (N, 3), jnp.float32, minval=-1.1, maxval=1.1)

    out = feature_volume_forward(x, fm, globalFeats=False)
    out = jax.block_until_ready(out)

    ref = _grid_sample_ref(fm, x)
    assert out.shape == (N, fdim), out.shape
    assert jnp.allclose(out, ref, atol=1e-5, rtol=1e-5), "mismatch vs reference"

    # Also exercise the (N, M, 3) branch of forward().
    x2 = jax.random.uniform(k_x2, (10, 5, 3), jnp.float32, minval=-1.0, maxval=1.0)
    out2 = jax.block_until_ready(feature_volume_forward(x2, fm))
    ref2 = _grid_sample_ref(fm, x2.reshape(-1, 3)).reshape(10, 5, fdim)
    assert out2.shape == (10, 5, fdim), out2.shape
    assert jnp.allclose(out2, ref2, atol=1e-5, rtol=1e-5), "mismatch (3D branch)"

    print("KERNEL_OK")
</pallas_src>

<mosaic_0001>
module attributes {stable_mosaic.version = 11 : i64} {
  func.func @_fv_sample_kernel(%arg0: i32, %arg1: memref<3x128xf32, #tpu.memory_space<vmem>>, %arg2: memref<256x768xbf16, #tpu.memory_space<vmem>>, %arg3: memref<16x128xf32, #tpu.memory_space<vmem>>) attributes {dimension_semantics = [#tpu.dimension_semantics<parallel>], iteration_bounds = array<i64: 1>, scalar_prefetch = 0 : i64, scratch_operands = 0 : i64, tpu.core_type = #tpu.core_type<tc>, window_params = [{transform_indices = @transform_0, window_bounds = array<i64: 3, 128>}, {pipeline_mode = #tpu.pipeline_mode<synchronous>, transform_indices = @transform_1, window_bounds = array<i64: 256, 768>}, {transform_indices = @transform_2, window_bounds = array<i64: 16, 128>}]} {
    %c0 = arith.constant 0 : index
    %c0_0 = arith.constant 0 : index
    %0 = vector.load %arg1[%c0, %c0_0] : memref<3x128xf32, #tpu.memory_space<vmem>>, vector<3x128xf32>
    %cst = arith.constant 1.000000e+00 : f32
    %1 = vector.broadcast %cst : f32 to vector<3x128xf32>
    %2 = arith.addf %0, %1 : vector<3x128xf32>
    %cst_1 = arith.constant 4.000000e+00 : f32
    %3 = vector.broadcast %cst_1 : f32 to vector<3x128xf32>
    %4 = arith.mulf %2, %3 : vector<3x128xf32>
    %cst_2 = arith.constant 0.000000e+00 : f32
    %cst_3 = arith.constant 8.000000e+00 : f32
    %5 = vector.broadcast %cst_2 : f32 to vector<3x128xf32>
    %6 = arith.maximumf %5, %4 : vector<3x128xf32>
    %7 = vector.broadcast %cst_3 : f32 to vector<3x128xf32>
    %8 = arith.minimumf %7, %6 : vector<3x128xf32>
    %9 = math.floor %8 : vector<3x128xf32>
    %10 = arith.subf %8, %9 : vector<3x128xf32>
    %11 = arith.fptosi %9 : vector<3x128xf32> to vector<3x128xi32>
    %12 = vector.extract_strided_slice %11 {offsets = [0, 0], sizes = [1, 128], strides = [1, 1]} : vector<3x128xi32> to vector<1x128xi32>
    %13 = vector.extract_strided_slice %11 {offsets = [1, 0], sizes = [1, 128], strides = [1, 1]} : vector<3x128xi32> to vector<1x128xi32>
    %14 = vector.extract_strided_slice %11 {offsets = [2, 0], sizes = [1, 128], strides = [1, 1]} : vector<3x128xi32> to vector<1x128xi32>
    %15 = vector.extract_strided_slice %10 {offsets = [0, 0], sizes = [1, 128], strides = [1, 1]} : vector<3x128xf32> to vector<1x128xf32>
    %16 = vector.extract_strided_slice %10 {offsets = [1, 0], sizes = [1, 128], strides = [1, 1]} : vector<3x128xf32> to vector<1x128xf32>
    %17 = vector.extract_strided_slice %10 {offsets = [2, 0], sizes = [1, 128], strides = [1, 1]} : vector<3x128xf32> to vector<1x128xf32>
    %c81_i32 = arith.constant 81 : i32
    %18 = vector.broadcast %c81_i32 : i32 to vector<1x128xi32>
    %19 = arith.muli %14, %18 : vector<1x128xi32>
    %c9_i32 = arith.constant 9 : i32
    %20 = vector.broadcast %c9_i32 : i32 to vector<1x128xi32>
    %21 = arith.muli %13, %20 : vector<1x128xi32>
    %22 = arith.addi %19, %21 : vector<1x128xi32>
    %23 = arith.addi %22, %12 : vector<1x128xi32>
    %24 = tpu.iota {dimensions = array<i32: 0>} : vector<768x128xi32>
    %25 = vector.broadcast %23 : vector<1x128xi32> to vector<768x128xi32>
    %26 = arith.cmpi eq, %24, %25 : vector<768x128xi32>
    %cst_4 = arith.constant 1.000000e+00 : f32
    %cst_5 = arith.constant 0.000000e+00 : f32
    %27 = vector.broadcast %cst_4 : f32 to vector<768x128xf32>
    %28 = vector.broadcast %cst_5 : f32 to vector<768x128xf32>
    %29 = arith.select %26, %27, %28 : vector<768x128xi1>, vector<768x128xf32>
    %30 = arith.truncf %29 : vector<768x128xf32> to vector<768x128xbf16>
    %c0_6 = arith.constant 0 : index
    %c0_7 = arith.constant 0 : index
    %31 = vector.load %arg2[%c0_6, %c0_7] : memref<256x768xbf16, #tpu.memory_space<vmem>>, vector<256x768xbf16>
    %cst_8 = arith.constant dense<0.000000e+00> : vector<256x128xf32>
    %32 = tpu.matmul %31, %30, %cst_8 {dimension_numbers = #tpu.dot_dimension_numbers<[1], [0], [0], [1], [0, 0, 1, 1], [], []>} : vector<256x768xbf16>, vector<768x128xbf16>, vector<256x128xf32> -> vector<256x128xf32>
    %33 = vector.extract_strided_slice %32 {offsets = [0, 0], sizes = [128, 128], strides = [1, 1]} : vector<256x128xf32> to vector<128x128xf32>
    %34 = vector.extract_strided_slice %32 {offsets = [128, 0], sizes = [128, 128], strides = [1, 1]} : vector<256x128xf32> to vector<128x128xf32>
    %35 = arith.addf %33, %34 : vector<128x128xf32>
    %cst_9 = arith.constant 1.000000e+00 : f32
    %36 = vector.broadcast %cst_9 : f32 to vector<1x128xf32>
    %37 = arith.subf %36, %15 : vector<1x128xf32>
    %cst_10 = arith.constant 1.000000e+00 : f32
    %38 = vector.broadcast %cst_10 : f32 to vector<1x128xf32>
    %39 = arith.subf %38, %16 : vector<1x128xf32>
    %cst_11 = arith.constant 1.000000e+00 : f32
    %40 = vector.broadcast %cst_11 : f32 to vector<1x128xf32>
    %41 = arith.subf %40, %17 : vector<1x128xf32>
    %42 = arith.mulf %41, %39 : vector<1x128xf32>
    %43 = arith.mulf %42, %37 : vector<1x128xf32>
    %44 = vector.extract_strided_slice %35 {offsets = [0, 0], sizes = [16, 128], strides = [1, 1]} : vector<128x128xf32> to vector<16x128xf32>
    %45 = vector.broadcast %43 : vector<1x128xf32> to vector<16x128xf32>
    %46 = arith.mulf %45, %44 : vector<16x128xf32>
    %47 = arith.mulf %41, %39 : vector<1x128xf32>
    %48 = arith.mulf %47, %15 : vector<1x128xf32>
    %49 = vector.extract_strided_slice %35 {offsets = [16, 0], sizes = [16, 128], strides = [1, 1]} : vector<128x128xf32> to vector<16x128xf32>
    %50 = vector.broadcast %48 : vector<1x128xf32> to vector<16x128xf32>
    %51 = arith.mulf %50, %49 : vector<16x128xf32>
    %52 = arith.addf %46, %51 : vector<16x128xf32>
    %53 = arith.mulf %41, %16 : vector<1x128xf32>
    %54 = arith.mulf %53, %37 : vector<1x128xf32>
    %55 = vector.extract_strided_slice %35 {offsets = [32, 0], sizes = [16, 128], strides = [1, 1]} : vector<128x128xf32> to vector<16x128xf32>
    %56 = vector.broadcast %54 : vector<1x128xf32> to vector<16x128xf32>
    %57 = arith.mulf %56, %55 : vector<16x128xf32>
    %58 = arith.addf %52, %57 : vector<16x128xf32>
    %59 = arith.mulf %41, %16 : vector<1x128xf32>
    %60 = arith.mulf %59, %15 : vector<1x128xf32>
    %61 = vector.extract_strided_slice %35 {offsets = [48, 0], sizes = [16, 128], strides = [1, 1]} : vector<128x128xf32> to vector<16x128xf32>
    %62 = vector.broadcast %60 : vector<1x128xf32> to vector<16x128xf32>
    %63 = arith.mulf %62, %61 : vector<16x128xf32>
    %64 = arith.addf %58, %63 : vector<16x128xf32>
    %65 = arith.mulf %17, %39 : vector<1x128xf32>
    %66 = arith.mulf %65, %37 : vector<1x128xf32>
    %67 = vector.extract_strided_slice %35 {offsets = [64, 0], sizes = [16, 128], strides = [1, 1]} : vector<128x128xf32> to vector<16x128xf32>
    %68 = vector.broadcast %66 : vector<1x128xf32> to vector<16x128xf32>
    %69 = arith.mulf %68, %67 : vector<16x128xf32>
    %70 = arith.addf %64, %69 : vector<16x128xf32>
    %71 = arith.mulf %17, %39 : vector<1x128xf32>
    %72 = arith.mulf %71, %15 : vector<1x128xf32>
    %73 = vector.extract_strided_slice %35 {offsets = [80, 0], sizes = [16, 128], strides = [1, 1]} : vector<128x128xf32> to vector<16x128xf32>
    %74 = vector.broadcast %72 : vector<1x128xf32> to vector<16x128xf32>
    %75 = arith.mulf %74, %73 : vector<16x128xf32>
    %76 = arith.addf %70, %75 : vector<16x128xf32>
    %77 = arith.mulf %17, %16 : vector<1x128xf32>
    %78 = arith.mulf %77, %37 : vector<1x128xf32>
    %79 = vector.extract_strided_slice %35 {offsets = [96, 0], sizes = [16, 128], strides = [1, 1]} : vector<128x128xf32> to vector<16x128xf32>
    %80 = vector.broadcast %78 : vector<1x128xf32> to vector<16x128xf32>
    %81 = arith.mulf %80, %79 : vector<16x128xf32>
    %82 = arith.addf %76, %81 : vector<16x128xf32>
    %83 = arith.mulf %17, %16 : vector<1x128xf32>
    %84 = arith.mulf %83, %15 : vector<1x128xf32>
    %85 = vector.extract_strided_slice %35 {offsets = [112, 0], sizes = [16, 128], strides = [1, 1]} : vector<128x128xf32> to vector<16x128xf32>
    %86 = vector.broadcast %84 : vector<1x128xf32> to vector<16x128xf32>
    %87 = arith.mulf %86, %85 : vector<16x128xf32>
    %88 = arith.addf %82, %87 : vector<16x128xf32>
    %c0_12 = arith.constant 0 : index
    %c0_13 = arith.constant 0 : index
    %89 = vector.load %arg3[%c0_12, %c0_13] : memref<16x128xf32, #tpu.memory_space<vmem>>, vector<16x128xf32>
    tpu.vector_store %arg3[%c0_12, %c0_13], %88 {strides = array<i32>} : memref<16x128xf32, #tpu.memory_space<vmem>>, vector<16x128xf32>,
    return
  }
  func.func @transform_0(%arg0: i32) -> (i32, i32) {
    %c0_i32 = arith.constant 0 : i32
    %c0_i32_0 = arith.constant 0 : i32
    return %c0_i32, %arg0 : i32, i32
  }
  func.func @transform_1(%arg0: i32) -> (i32, i32) {
    %c0_i32 = arith.constant 0 : i32
    %c0_i32_0 = arith.constant 0 : i32
    %c0_i32_1 = arith.constant 0 : i32
    return %c0_i32, %c0_i32_0 : i32, i32
  }
  func.func @transform_2(%arg0: i32) -> (i32, i32) {
    %c0_i32 = arith.constant 0 : i32
    %c0_i32_0 = arith.constant 0 : i32
    return %c0_i32, %arg0 : i32, i32
  }
}

</mosaic_0001>

<bundles_post_ra>
// kernel: tpu_custom_call.1
= control target key start
LH: loop header
LB: loop body
LE: loop exit
PB: predicated region body
PF: predicated region fallthrough
CT: control target
= control target key end

     0   :  { %7 = vsyncpa [#allocation3], 0  ;;  %s2877_s0 = inlined_call_operand.hbm [shape: f32[3,128], index: 0, kind: input, shape index: {}]   ;;  %s2878_s1 = inlined_call_operand.hbm [shape: bf16[256,768], index: 1, kind: input, shape index: {}]   ;;  %s2879_s2 = inlined_call_operand.hbm [shape: f32[16,128], index: 2, kind: output, shape index: {}]  }
   0x1   :  { %8 = vsyncpa [#allocation6], 0 }
   0x2   :  { %9 = vsyncpa [#allocation4], 0  ;;  %s15_s11 = sshll.u32 %s2877_s0, 4  ;;  %s2283_s12 = smov [#allocation2]   ;;  %s16_s11 = int_to_ptr.hbm [resolvable:$true] %s15_s11 }
   0x3   :  { %s17_s13 = sshll.u32 %s2283_s12, 4  ;;  %s25_s16 = sshll.u32 %s2878_s1, 4  ;;  %s18_s13 = int_to_ptr.vmem [resolvable:$true] %s17_s13  ;;  %s26_s16 = int_to_ptr.hbm [resolvable:$true] %s25_s16 }
   0x4   :  { %20 = dma.hbm_to_vmem [thread:$0]  %s16_s11, 64, %s18_s13, [#allocation3]  }
   0x5   :  { %s2284_s17 = smov [#allocation5]   ;;  %s2285_s19 = smov 384  }
   0x6   :  { %s27_s18 = sshll.u32 %s2284_s17, 4  ;;  %s2286_s20 = smov 24   ;;  %s28_s18 = int_to_ptr.vmem [resolvable:$true] %s27_s18 }
   0x7   :  { %33 = dma.hbm_to_vmem [thread:$0]  %s26_s16, 12288, %s28_s18, [#allocation6], %s2285_s19, %s2285_s19, %s2286_s20  }
   0x8   :  { %2277 = dma.done.wait [#allocation3], 64  }
   0x9   :  { %2278 = vsyncadd [#allocation3], 4294967232 }
   0xa   :  { %2279 = dma.done.wait [#allocation6], 12288  }
   0xb   :  { %2280 = vsyncadd [#allocation6], 4294955008  ;;  %v42_v0 = vld [vmem:[#allocation2] sm:$0x7]  ;;  %v56_v6 = vlaneseq  ;;  %v2287_v28 = vmov 1.0|1.0  }
   0xc   :  { %v43_v1 = vadd.f32 1.0, %v42_v0  ;;  %v2402_v49 = vld [vmem:[#allocation5 + $0x180] sm:$0xf]  ;;  %v2404_v50 = vld [vmem:[#allocation5 + $0x194] sm:$0xf0]  ;;  %s2288_s0 = smov [#allocation7]  }
   0xd   :  { %v2317_v10 = vshrl.u32 %v56_v6, 7  ;;  %v2408_v51 = vld [vmem:[#allocation5 + $0x184] sm:$0xf]  ;;  %v2410_v52 = vld [vmem:[#allocation5 + $0x198] sm:$0xf0]  ;;  %v1798_v61 = vor.u32 %v2404_v50, %v2402_v49  ;;  %s1587_s1 = sshll.u32 %s2288_s0, 4  ;;  %s1588_s1 = int_to_ptr.vmem [resolvable:$true] %s1587_s1 }
   0xe   :  { %v44_v2 = vmul.f32 4.0, %v43_v1  ;;  %v1802_v62 = vor.u32 %v2408_v51, %v2410_v52  ;;  %v1605_v63 = vld [vmem:[#allocation5] sm:$0xf]  ;;  %v2086_v0 = vld [vmem:[#allocation5 + $0x14] sm:$0xf0]  ;;  %s1589_s23 = sshll.u32 %s2879_s2, 4  ;;  %s1590_s23 = int_to_ptr.hbm [resolvable:$true] %s1589_s23 }
   0xf   :  { %v71_v14 = vadd.s32 112, %v2317_v10  ;;  %v72_v16 = vadd.s32 120, %v2317_v10  ;;  %v87_v17 = vadd.s32 240, %v2317_v10  ;;  %v88_v18 = vadd.s32 248, %v2317_v10  ;;  %v2143_v57 = vld [vmem:[#allocation5 + $0x1e4] sm:$0xf] }
  0x10   :  { %v45_v3 = vmax.f32 %v44_v2, 0.0  ;;  %v69_v19 = vadd.s32 96, %v2317_v10  ;;  %v70_v20 = vadd.s32 104, %v2317_v10  ;;  %v85_v21 = vadd.s32 224, %v2317_v10  ;;  %v1847_v60 = vld [vmem:[#allocation5 + $0x1f8] sm:$0xf0] }
  0x11   :  { %v86_v22 = vadd.s32 232, %v2317_v10  ;;  %v67_v24 = vadd.s32 80, %v2317_v10  ;;  %v68_v25 = vadd.s32 88, %v2317_v10  ;;  %v83_v26 = vadd.s32 208, %v2317_v10  ;;  %s2289_s24 = smov 128   ;;  %s2290_s25 = smov 8  }
  0x12   :  { %v2312_v4 = vmin.f32 %v45_v3, 8.0  ;;  %v84_v27 = vadd.s32 216, %v2317_v10  ;;  %v65_v29 = vadd.s32 64, %v2317_v10  ;;  %v66_v30 = vadd.s32 72, %v2317_v10 }
  0x13   :  { %v81_v31 = vadd.s32 192, %v2317_v10  ;;  %v82_v32 = vadd.s32 200, %v2317_v10  ;;  %v63_v33 = vadd.s32 48, %v2317_v10  ;;  %v64_v34 = vadd.s32 56, %v2317_v10 }
  0x14   :  { %v47_v5 = vfloor.f32 %v2312_v4  ;;  %v79_v35 = vadd.s32 176, %v2317_v10  ;;  %v80_v36 = vadd.s32 184, %v2317_v10  ;;  %v61_v37 = vadd.s32 32, %v2317_v10 }
  0x15   :  { %v62_v38 = vadd.s32 40, %v2317_v10  ;;  %v77_v39 = vadd.s32 160, %v2317_v10  ;;  %v78_v40 = vadd.s32 168, %v2317_v10  ;;  %v59_v41 = vadd.s32 16, %v2317_v10 }
  0x16   :  { %v2196_v7 = vcvt.f32.s32 %v47_v5  ;;  %v60_v42 = vadd.s32 24, %v2317_v10  ;;  %v75_v43 = vadd.s32 144, %v2317_v10  ;;  %v76_v44 = vadd.s32 152, %v2317_v10 }
  0x17   :  { %v58_v45 = vadd.s32 8, %v2317_v10  ;;  %v73_v46 = vadd.s32 128, %v2317_v10  ;;  %v74_v47 = vadd.s32 136, %v2317_v10  ;;  %v103_v53 = vadd.s32 368, %v2317_v10 }
  0x18   :  { %v50_v8 = vmul.u32 81, %v2196_v7  ;;  %v51_v9 = vmul.u32 9, %v2196_v7  ;;  %v54_v12 = vrot.slane %v2196_v7, 6  ;;  %v104_v54 = vadd.s32 376, %v2317_v10 }
  0x19   :  { %v119_v55 = vadd.s32 496, %v2317_v10  ;;  %v120_v56 = vadd.s32 504, %v2317_v10  ;;  %v135_v58 = vadd.s32 624, %v2317_v10  ;;  %v136_v59 = vadd.s32 632, %v2317_v10 }
  0x1a   :  { %v52_v11 = vrot.slane %v51_v9, 7  ;;  %v151_v1 = vadd.s32 752, %v2317_v10  ;;  %v152_v2 = vadd.s32 760, %v2317_v10  ;;  %v101_v3 = vadd.s32 352, %v2317_v10 }
  0x1b   :  { %v102_v6 = vadd.s32 360, %v2317_v10  ;;  %v118_v9 = vadd.s32 488, %v2317_v10  ;;  %v98_v48 = vadd.s32 328, %v2317_v10  ;;  %v113_v49 = vadd.s32 448, %v2317_v10 }
  0x1c   :  { %v53_v13 = vadd.s32 %v52_v11, %v50_v8  ;;  %v117_v8 = vadd.s32 480, %v2317_v10  ;;  %v114_v50 = vadd.s32 456, %v2317_v10  ;;  %v129_v51 = vadd.s32 576, %v2317_v10 }
  0x1d   :  { %v130_v52 = vadd.s32 584, %v2317_v10  ;;  %v111_v7 = vadd.s32 432, %v2317_v10  ;;  %v128_v11 = vadd.s32 568, %v2317_v10 }
  0x1e   :  { %v55_v15 = vadd.s32 %v54_v12, %v53_v13  ;;  %v1606_v12 = vor.u32 %v2086_v0, %v1605_v63  ;;  %v2083_v13 = vld [vmem:[#allocation5 + $0x4] sm:$0xf] }
  0x20   :  { %v2327_v23 = vperm.slane %v55_v15, 2  ;;  %v2152_v15 = vld [vmem:[#allocation5 + $0x224] sm:$0xf0] }
  0x22   :  { %vm168_vm0 = vcmp.eq.s32.totalorder %v71_v14, %v2327_v23  ;;  %vm169_vm1 = vcmp.eq.s32.totalorder %v72_v16, %v2327_v23  ;;  %vm184_vm2 = vcmp.eq.s32.totalorder %v87_v17, %v2327_v23  ;;  %vm185_vm3 = vcmp.eq.s32.totalorder %v88_v18, %v2327_v23  ;;  %v1607_v14 = vld [vmem:[#allocation5 + $0x18] sm:$0xf0] }
  0x23   :  { %vm1987_vm4 = vmpackc.low %vm169_vm1, %vm168_vm0  ;;  %vm166_vm5 = vcmp.eq.s32.totalorder %v69_v19, %v2327_v23  ;;  %vm167_vm6 = vcmp.eq.s32.totalorder %v70_v20, %v2327_v23  ;;  %vm182_vm7 = vcmp.eq.s32.totalorder %v85_v21, %v2327_v23  ;;  %vm183_vm8 = vcmp.eq.s32.totalorder %v86_v22, %v2327_v23  ;;  %v1679_v21 = vld [vmem:[#allocation5 + $0xa8] sm:$0xf0] }
  0x24   :  { %2179 = vmatpush.bf16.msk.msra.mxu2 %vm1987_vm4, %v2287_v28  ;;  %vm2003_vm9 = vmpackc.low %vm185_vm3, %vm184_vm2  ;;  %1988 = vmatpush.bf16.msk.msra.mxu0 %vm1987_vm4, %v2287_v28  ;;  %vm164_vm12 = vcmp.eq.s32.totalorder %v67_v24, %v2327_v23  ;;  %vm165_vm13 = vcmp.eq.s32.totalorder %v68_v25, %v2327_v23  ;;  %vm180_vm14 = vcmp.eq.s32.totalorder %v83_v26, %v2327_v23  ;;  %v133_v16 = vadd.s32 608, %v2317_v10 }
  0x25   :  { %2187 = vmatpush.bf16.msk.msra.mxu3 %vm2003_vm9, %v2287_v28  ;;  %2004 = vmatpush.bf16.msk.msra.mxu1 %vm2003_vm9, %v2287_v28  ;;  %vm1989_vm10 = vmpackc.low %vm167_vm6, %vm166_vm5  ;;  %vm181_vm15 = vcmp.eq.s32.totalorder %v84_v27, %v2327_v23  ;;  %vm162_vm2 = vcmp.eq.s32.totalorder %v65_v29, %v2327_v23  ;;  %vm163_vm3 = vcmp.eq.s32.totalorder %v66_v30, %v2327_v23  ;;  %v134_v17 = vadd.s32 616, %v2317_v10 }
  0x26   :  { %vm2005_vm11 = vmpackc.low %vm183_vm8, %vm182_vm7  ;;  %vm178_vm4 = vcmp.eq.s32.totalorder %v81_v31, %v2327_v23  ;;  %vm179_vm5 = vcmp.eq.s32.totalorder %v82_v32, %v2327_v23  ;;  %vm160_vm8 = vcmp.eq.s32.totalorder %v63_v33, %v2327_v23  ;;  %vm161_vm9 = vcmp.eq.s32.totalorder %v64_v34, %v2327_v23 }
  0x27   :  { %vm1991_vm0 = vmpackc.low %vm165_vm13, %vm164_vm12  ;;  %v149_v18 = vadd.s32 736, %v2317_v10  ;;  %v150_v19 = vadd.s32 744, %v2317_v10  ;;  %v1610_v20 = vor.u32 %v2083_v13, %v1607_v14  ;;  %v99_v25 = vadd.s32 336, %v2317_v10  ;;  %v1869_v14 = vld [vmem:[#allocation5 + $0x210] sm:$0xf] }
  0x28   :  { %2180 = vmatpush.bf16.msk.msra.mxu2 %vm1989_vm10, %v2287_v28  ;;  %1990 = vmatpush.bf16.msk.msra.mxu0 %vm1989_vm10, %v2287_v28  ;;  %vm2007_vm1 = vmpackc.low %vm181_vm15, %vm180_vm14  ;;  %vm176_vm10 = vcmp.eq.s32.totalorder %v79_v35, %v2327_v23  ;;  %vm158_vm14 = vcmp.eq.s32.totalorder %v61_v37, %v2327_v23  ;;  %vm159_vm15 = vcmp.eq.s32.totalorder %v62_v38, %v2327_v23  ;;  %v100_v26 = vadd.s32 344, %v2317_v10  ;;  %v1821_v35 = vld [vmem:[#allocation5 + $0x1b0] sm:$0xf]  ;;  %v2137_v37 = vld [vmem:[#allocation5 + $0x1b4] sm:$0xf] }
  0x29   :  { %2188 = vmatpush.bf16.msk.msra.mxu3 %vm2005_vm11, %v2287_v28  ;;  %2006 = vmatpush.bf16.msk.msra.mxu1 %vm2005_vm11, %v2287_v28  ;;  %vm1993_vm6 = vmpackc.low %vm163_vm3, %vm162_vm2  ;;  %vm177_vm11 = vcmp.eq.s32.totalorder %v80_v36, %v2327_v23  ;;  %v115_v27 = vadd.s32 464, %v2317_v10  ;;  %v116_v30 = vadd.s32 472, %v2317_v10  ;;  %v131_v31 = vadd.s32 592, %v2317_v10  ;;  %v2140_v36 = vld [vmem:[#allocation5 + $0x1c4] sm:$0xf0] }
  0x2a   :  { %vm2009_vm7 = vmpackc.low %vm179_vm5, %vm178_vm4  ;;  %vm156_vm4 = vcmp.eq.s32.totalorder %v59_v41, %v2327_v23  ;;  %vm157_vm5 = vcmp.eq.s32.totalorder %v60_v42, %v2327_v23  ;;  %v132_v32 = vadd.s32 600, %v2317_v10  ;;  %v147_v33 = vadd.s32 720, %v2317_v10  ;;  %v1629_v38 = vld [vmem:[#allocation5 + $0x30] sm:$0xf]  ;;  %v2089_v41 = vld [vmem:[#allocation5 + $0x34] sm:$0xf] }
  0x2b   :  { %vm1995_vm12 = vmpackc.low %vm161_vm9, %vm160_vm8  ;;  %vm154_vm8 = vcmp.eq.s32.totalorder %v2317_v10, %v2327_v23  ;;  %vm155_vm9 = vcmp.eq.s32.totalorder %v58_v45, %v2327_v23  ;;  %v148_v34 = vadd.s32 728, %v2317_v10  ;;  %v1631_v42 = vld [vmem:[#allocation5 + $0x48] sm:$0xf0]  ;;  %v144_v13 = vadd.s32 696, %v2317_v10 }
  0x2c   :  { %2181 = vmatpush.bf16.msk.msra.mxu2 %vm1991_vm0, %v2287_v28  ;;  %1992 = vmatpush.bf16.msk.msra.mxu0 %vm1991_vm0, %v2287_v28  ;;  %vm2011_vm13 = vmpackc.low %vm177_vm11, %vm176_vm10  ;;  %vm174_vm0 = vcmp.eq.s32.totalorder %v77_v39, %v2327_v23  ;;  %vm170_vm11 = vcmp.eq.s32.totalorder %v73_v46, %v2327_v23  ;;  %v2092_v39 = vld [vmem:[#allocation5 + $0x44] sm:$0xf0]  ;;  %v1634_v46 = vor.u32 %v2089_v41, %v1631_v42  ;;  %v94_v29 = vadd.s32 296, %v2317_v10  ;;  %v1895_v41 = vld [vmem:[#allocation5 + $0x258] sm:$0xf0] }
  0x2d   :  { %2189 = vmatpush.bf16.msk.msra.mxu3 %vm2007_vm1, %v2287_v28  ;;  %2008 = vmatpush.bf16.msk.msra.mxu1 %vm2007_vm1, %v2287_v28  ;;  %vm175_vm1 = vcmp.eq.s32.totalorder %v78_v40, %v2327_v23  ;;  %vm1997_vm2 = vmpackc.low %vm159_vm15, %vm158_vm14  ;;  %vm200_vm14 = vcmp.eq.s32.totalorder %v103_v53, %v2327_v23  ;;  %vm201_vm15 = vcmp.eq.s32.totalorder %v104_v54, %v2327_v23  ;;  %v1823_v40 = vld [vmem:[#allocation5 + $0x1c8] sm:$0xf0]  ;;  %v145_v53 = vadd.s32 704, %v2317_v10  ;;  %v2107_v42 = vld [vmem:[#allocation5 + $0xc4] sm:$0xf] }
  0x2e   :  { %vm2396_vm3 = vmpackc.low %vm175_vm1, %vm174_vm0  ;;  %vm216_vm1 = vcmp.eq.s32.totalorder %v119_v55, %v2327_v23  ;;  %v1826_v45 = vor.u32 %v2137_v37, %v1823_v40  ;;  %v146_v54 = vadd.s32 712, %v2317_v10  ;;  %v1845_v55 = vld [vmem:[#allocation5 + $0x1e0] sm:$0xf]  ;;  %v1870_v22 = vor.u32 %v2152_v15, %v1869_v14  ;;  %v2158_v37 = vld [vmem:[#allocation5 + $0x254] sm:$0xf0] }
  0x2f   :  { %vm2431_vm10 = vmpackc.low %vm157_vm5, %vm156_vm4  ;;  %vm232_vm4 = vcmp.eq.s32.totalorder %v135_v58, %v2327_v23  ;;  %vm233_vm5 = vcmp.eq.s32.totalorder %v136_v59, %v2327_v23  ;;  %v1653_v58 = vld [vmem:[#allocation5 + $0x60] sm:$0xf]  ;;  %v2098_v59 = vld [vmem:[#allocation5 + $0x74] sm:$0xf0]  ;;  %v138_v14 = vadd.s32 648, %v2317_v10 }
  0x30   :  { %2182 = vmatpush.bf16.msk.msra.mxu2 %vm1993_vm6, %v2287_v28  ;;  %1994 = vmatpush.bf16.msk.msra.mxu0 %vm1993_vm6, %v2287_v28  ;;  %vm172_vm6 = vcmp.eq.s32.totalorder %v75_v43, %v2327_v23  ;;  %vm2468_vm0 = vmpackc.low %vm155_vm9, %vm154_vm8  ;;  %vm249_vm8 = vcmp.eq.s32.totalorder %v152_v2, %v2327_v23  ;;  %v1822_v43 = vor.u32 %v2140_v36, %v1821_v35  ;;  %v142_v35 = vadd.s32 680, %v2317_v10  ;;  %v1893_v36 = vld [vmem:[#allocation5 + $0x240] sm:$0xf]  ;;  %v2110_v40 = vld [vmem:[#allocation5 + $0xd4] sm:$0xf0] }
  0x31   :  { %2190 = vmatpush.bf16.msk.msra.mxu3 %vm2009_vm7, %v2287_v28  ;;  %2010 = vmatpush.bf16.msk.msra.mxu1 %vm2009_vm7, %v2287_v28  ;;  %vm173_vm7 = vcmp.eq.s32.totalorder %v76_v44, %v2327_v23  ;;  %v1630_v44 = vor.u32 %v2092_v39, %v1629_v38  ;;  %v1654_v0 = vor.u32 %v2098_v59, %v1653_v58  ;;  %v2155_v38 = vld [vmem:[#allocation5 + $0x244] sm:$0xf]  ;;  %v1701_v39 = vld [vmem:[#allocation5 + $0xc0] sm:$0xf]  ;;  %v2161_v58 = vld [vmem:[#allocation5 + $0x274] sm:$0xf] }
  0x32   :  { %v1725_v59 = vld [vmem:[#allocation5 + $0xf0] sm:$0xf]  ;;  %v1941_v15 = vld [vmem:[#allocation5 + $0x2a0] sm:$0xf] }
  0x34   :  { %2183 = vmatpush.bf16.msk.msra.mxu2 %vm1995_vm12, %v2287_v28  ;;  %1996 = vmatpush.bf16.msk.msra.mxu0 %vm1995_vm12, %v2287_v28  ;;  %vm171_vm12 = vcmp.eq.s32.totalorder %v74_v47, %v2327_v23  ;;  %v97_v47 = vadd.s32 320, %v2317_v10 }
  0x35   :  { %2191 = vmatpush.bf16.msk.msra.mxu3 %vm2011_vm13, %v2287_v28  ;;  %2012 = vmatpush.bf16.msk.msra.mxu1 %vm2011_vm13, %v2287_v28  ;;  %vm2443_vm13 = vmpackc.low %vm173_vm7, %vm172_vm6  ;;  %vm248_vm7 = vcmp.eq.s32.totalorder %v151_v1, %v2327_v23  ;;  %v1850_v1 = vor.u32 %v2143_v57, %v1847_v60  ;;  %v2164_v57 = vld [vmem:[#allocation5 + $0x284] sm:$0xf0] }
  0x36   :  { %vm2496_vm6 = vmpackc.low %vm201_vm15, %vm200_vm14  ;;  %vm215_vm14 = vcmp.eq.s32.totalorder %v118_v9, %v2327_v23  ;;  %v127_v9 = vadd.s32 560, %v2317_v10  ;;  %v2116_v60 = vld [vmem:[#allocation5 + $0x104] sm:$0xf0] }
  0x37   :  { %vm2536_vm15 = vmpackc.low %vm249_vm8, %vm248_vm7  ;;  %vm196_vm8 = vcmp.eq.s32.totalorder %v99_v25, %v2327_v23 }
  0x38   :  { %2184 = vmatpush.bf16.msk.msra.mxu2 %vm1997_vm2, %v2287_v28  ;;  %1998 = vmatpush.bf16.msk.msra.mxu0 %vm1997_vm2, %v2287_v28  ;;  %vm217_vm2 = vcmp.eq.s32.totalorder %v120_v56, %v2327_v23  ;;  %v2146_v56 = vld [vmem:[#allocation5 + $0x1f4] sm:$0xf0] }
  0x39   :  { %2192 = vmatpush.bf16.msk.msra.mxu3 %vm2396_vm3, %v2287_v28  ;;  %2014 = vmatpush.bf16.msk.msra.mxu1 %vm2396_vm3, %v2287_v28  ;;  %vm2486_vm3 = vmpackc.low %vm171_vm12, %vm170_vm11  ;;  %vm199_vm11 = vcmp.eq.s32.totalorder %v102_v6, %v2327_v23  ;;  %v1846_v63 = vor.u32 %v2146_v56, %v1845_v55  ;;  %v96_v6 = vadd.s32 312, %v2317_v10  ;;  %v140_v55 = vadd.s32 664, %v2317_v10  ;;  %v1917_v56 = vld [vmem:[#allocation5 + $0x270] sm:$0xf] }
  0x3a   :  { %vm2035_vm9 = vmpackc.low %vm217_vm2, %vm216_vm1  ;;  %vm230_vm1 = vcmp.eq.s32.totalorder %v133_v16, %v2327_v23  ;;  %vm231_vm2 = vcmp.eq.s32.totalorder %v134_v17, %v2327_v23  ;;  %v2149_v16 = vld [vmem:[#allocation5 + $0x214] sm:$0xf]  ;;  %v1677_v17 = vld [vmem:[#allocation5 + $0x90] sm:$0xf] }
  0x3b   :  { %vm2520_vm12 = vmpackc.low %vm233_vm5, %vm232_vm4  ;;  %vm246_vm4 = vcmp.eq.s32.totalorder %v149_v18, %v2327_v23  ;;  %vm247_vm5 = vcmp.eq.s32.totalorder %v150_v19, %v2327_v23  ;;  %v2104_v18 = vld [vmem:[#allocation5 + $0xa4] sm:$0xf0]  ;;  %v1871_v19 = vld [vmem:[#allocation5 + $0x228] sm:$0xf0] }
  0x3c   :  { %2185 = vmatpush.bf16.msk.msra.mxu2 %vm2431_vm10, %v2287_v28  ;;  %2000 = vmatpush.bf16.msk.msra.mxu0 %vm2431_vm10, %v2287_v28  ;;  %vm198_vm10 = vcmp.eq.s32.totalorder %v101_v3, %v2327_v23  ;;  %vm2069_vm7 = vmpackc.low %vm247_vm5, %vm246_vm4  ;;  %vm194_vm4 = vcmp.eq.s32.totalorder %v97_v47, %v2327_v23  ;;  %vm195_vm5 = vcmp.eq.s32.totalorder %v98_v48, %v2327_v23  ;;  %v95_v3 = vadd.s32 304, %v2317_v10 }
  0x3d   :  { %2193 = vmatpush.bf16.msk.msra.mxu3 %vm2443_vm13, %v2287_v28  ;;  %2016 = vmatpush.bf16.msk.msra.mxu1 %vm2443_vm13, %v2287_v28  ;;  %vm214_vm13 = vcmp.eq.s32.totalorder %v117_v8, %v2327_v23  ;;  %v112_v8 = vadd.s32 440, %v2317_v10  ;;  %v1678_v24 = vor.u32 %v2104_v18, %v1677_v17  ;;  %v1874_v25 = vor.u32 %v2149_v16, %v1871_v19  ;;  %v2170_v16 = vld [vmem:[#allocation5 + $0x2b4] sm:$0xf0]  ;;  %v2167_v17 = vld [vmem:[#allocation5 + $0x2a4] sm:$0xf] }
  0x3e   :  { %v91_v48 = vadd.s32 272, %v2317_v10  ;;  %v1749_v18 = vld [vmem:[#allocation5 + $0x120] sm:$0xf]  ;;  %v1943_v19 = vld [vmem:[#allocation5 + $0x2b8] sm:$0xf0] }
  0x40   :  { %2186 = vmatpush.bf16.msk.msra.mxu2 %vm2468_vm0, %v2287_v28  ;;  %2002 = vmatpush.bf16.msk.msra.mxu0 %vm2468_vm0, %v2287_v28  ;;  %vm2546_vm0 = vmpackc.low %vm199_vm11, %vm198_vm10  ;;  %vm212_vm10 = vcmp.eq.s32.totalorder %v115_v27, %v2327_v23  ;;  %v93_v27 = vadd.s32 288, %v2317_v10 }
  0x41   :  { %2194 = vmatpush.bf16.msk.msra.mxu3 %vm2486_vm3, %v2287_v28  ;;  %2018 = vmatpush.bf16.msk.msra.mxu1 %vm2486_vm3, %v2287_v28  ;;  %vm2037_vm3 = vmpackc.low %vm215_vm14, %vm214_vm13  ;;  %vm228_vm13 = vcmp.eq.s32.totalorder %v131_v31, %v2327_v23  ;;  %vm229_vm14 = vcmp.eq.s32.totalorder %v132_v32, %v2327_v23  ;;  %v110_v31 = vadd.s32 424, %v2317_v10  ;;  %v125_v32 = vadd.s32 544, %v2317_v10 }
  0x43   :  { %1018 = vmatmul.bf16.vlgmr.msra.gmra.mxu2 %v1798_v61  ;;  %978 = vmatmul.bf16.vlgmr.msra.gmra.mxu0 %v1606_v12  ;;  %v2095_v61 = vld [vmem:[#allocation5 + $0x64] sm:$0xf]  ;;  %v143_v12 = vadd.s32 688, %v2317_v10 }
  0x44   :  { %2020 = vmatpush.bf16.msk.msrb.mxu2 %vm2496_vm6, %v2287_v28  ;;  %1107 = vmatmul.bf16.vlgmr.msra.gmra.mxu3 %v1802_v62  ;;  %vm2563_vm6 = vmpackc.low %vm231_vm2, %vm230_vm1  ;;  %vm245_vm2 = vcmp.eq.s32.totalorder %v148_v34, %v2327_v23  ;;  %v1655_v62 = vld [vmem:[#allocation5 + $0x78] sm:$0xf0]  ;;  %v141_v34 = vadd.s32 672, %v2317_v10 }
  0x45   :  { %2036 = vmatpush.bf16.msk.msrb.mxu3 %vm2035_vm9, %v2287_v28  ;;  %1067 = vmatmul.bf16.vlgmr.msra.gmra.mxu1 %v1610_v20  ;;  %vm197_vm9 = vcmp.eq.s32.totalorder %v100_v26, %v2327_v23  ;;  %vm2055_vm1 = vmpackc.low %vm229_vm14, %vm228_vm13  ;;  %vm243_vm14 = vcmp.eq.s32.totalorder %v146_v54, %v2327_v23  ;;  %v1658_v2 = vor.u32 %v2095_v61, %v1655_v62  ;;  %v2101_v20 = vld [vmem:[#allocation5 + $0x94] sm:$0xf]  ;;  %v139_v54 = vadd.s32 656, %v2317_v10  ;;  %v1919_v61 = vld [vmem:[#allocation5 + $0x288] sm:$0xf0] }
  0x46   :  { %2052 = vmatpush.bf16.msk.msrb.mxu0 %vm2520_vm12, %v2287_v28  ;;  %2068 = vmatpush.bf16.msk.msrb.mxu1 %vm2536_vm15, %v2287_v28  ;;  %vm2023_vm11 = vmpackc.low %vm197_vm9, %vm196_vm8  ;;  %vm213_vm12 = vcmp.eq.s32.totalorder %v116_v30, %v2327_v23  ;;  %vm211_vm8 = vcmp.eq.s32.totalorder %v114_v50, %v2327_v23  ;;  %vm226_vm9 = vcmp.eq.s32.totalorder %v129_v51, %v2327_v23  ;;  %v109_v30 = vadd.s32 416, %v2317_v10  ;;  %v2113_v62 = vld [vmem:[#allocation5 + $0xf4] sm:$0xf] }
  0x47   :  { %vm2039_vm15 = vmpackc.low %vm213_vm12, %vm212_vm10  ;;  %vm227_vm10 = vcmp.eq.s32.totalorder %v130_v52, %v2327_v23  ;;  %vm242_vm12 = vcmp.eq.s32.totalorder %v145_v53, %v2327_v23  ;;  %v1682_v26 = vor.u32 %v2101_v20, %v1679_v21  ;;  %v107_v50 = vadd.s32 400, %v2317_v10  ;;  %v2119_v20 = vld [vmem:[#allocation5 + $0x124] sm:$0xf]  ;;  %v1751_v21 = vld [vmem:[#allocation5 + $0x138] sm:$0xf0] }
  0x48   :  { %2022 = vmatpush.bf16.msk.msrb.mxu2 %vm2546_vm0, %v2287_v28  ;;  %vm244_vm0 = vcmp.eq.s32.totalorder %v147_v33, %v2327_v23  ;;  %vm2057_vm13 = vmpackc.low %vm227_vm10, %vm226_vm9  ;;  %vm241_vm10 = vcmp.eq.s32.totalorder %v144_v13, %v2327_v23  ;;  %v126_v33 = vadd.s32 552, %v2317_v10  ;;  %v108_v51 = vadd.s32 408, %v2317_v10 }
  0x49   :  { %2038 = vmatpush.bf16.msk.msrb.mxu3 %vm2037_vm3, %v2287_v28  ;;  %vm2071_vm3 = vmpackc.low %vm245_vm2, %vm244_vm0  ;;  %vm192_vm0 = vcmp.eq.s32.totalorder %v95_v3, %v2327_v23  ;;  %vm208_vm2 = vcmp.eq.s32.totalorder %v111_v7, %v2327_v23  ;;  %v123_v52 = vadd.s32 528, %v2317_v10  ;;  %v124_v53 = vadd.s32 536, %v2317_v10 }
  0x4a   :  { %2054 = vmatpush.bf16.msk.msrb.mxu0 %vm2563_vm6, %v2287_v28  ;;  %2070 = vmatpush.bf16.msk.msrb.mxu1 %vm2069_vm7, %v2287_v28  ;;  %vm210_vm6 = vcmp.eq.s32.totalorder %v113_v49, %v2327_v23  ;;  %vm2025_vm7 = vmpackc.low %vm195_vm5, %vm194_vm4  ;;  %vm209_vm4 = vcmp.eq.s32.totalorder %v112_v8, %v2327_v23  ;;  %vm224_vm5 = vcmp.eq.s32.totalorder %v127_v9, %v2327_v23  ;;  %v92_v49 = vadd.s32 280, %v2317_v10 }
  0x4b   :  { %v90_v7 = vadd.s32 264, %v2317_v10  ;;  %v105_v8 = vadd.s32 384, %v2317_v10  ;;  %v106_v9 = vadd.s32 392, %v2317_v10  ;;  %v137_v13 = vadd.s32 640, %v2317_v10 }
  0x4c   :  { %2024 = vmatpush.bf16.msk.msrb.mxu2 %vm2023_vm11, %v2287_v28  ;;  %vm2041_vm11 = vmpackc.low %vm211_vm8, %vm210_vm6  ;;  %vm225_vm6 = vcmp.eq.s32.totalorder %v128_v11, %v2327_v23  ;;  %vm240_vm8 = vcmp.eq.s32.totalorder %v143_v12, %v2327_v23  ;;  %v121_v11 = vadd.s32 512, %v2317_v10  ;;  %v122_v12 = vadd.s32 520, %v2317_v10 }
  0x4d   :  { %2040 = vmatpush.bf16.msk.msrb.mxu3 %vm2039_vm15, %v2287_v28  ;;  %vm2073_vm15 = vmpackc.low %vm243_vm14, %vm242_vm12  ;;  %vm190_vm12 = vcmp.eq.s32.totalorder %v93_v27, %v2327_v23  ;;  %vm206_vm14 = vcmp.eq.s32.totalorder %v109_v30, %v2327_v23  ;;  %v2176_v27 = vld [vmem:[#allocation5 + $0x2e4] sm:$0xf0]  ;;  %v1773_v30 = vld [vmem:[#allocation5 + $0x150] sm:$0xf] }
  0x4e   :  { %2056 = vmatpush.bf16.msk.msrb.mxu0 %vm2055_vm1, %v2287_v28  ;;  %2072 = vmatpush.bf16.msk.msrb.mxu1 %vm2071_vm3, %v2287_v28  ;;  %vm193_vm1 = vcmp.eq.s32.totalorder %v96_v6, %v2327_v23  ;;  %vm2059_vm9 = vmpackc.low %vm225_vm6, %vm224_vm5  ;;  %vm239_vm6 = vcmp.eq.s32.totalorder %v142_v35, %v2327_v23  ;;  %v89_v6 = vadd.s32 256, %v2317_v10  ;;  %v2122_v10 = vld [vmem:[#allocation5 + $0x134] sm:$0xf0] }
  0x4f   :  { %vm2027_vm3 = vmpackc.low %vm193_vm1, %vm192_vm0  ;;  %vm207_vm0 = vcmp.eq.s32.totalorder %v110_v31, %v2327_v23  ;;  %vm222_vm1 = vcmp.eq.s32.totalorder %v125_v32, %v2327_v23  ;;  %v2128_v31 = vld [vmem:[#allocation5 + $0x164] sm:$0xf0]  ;;  %v2125_v32 = vld [vmem:[#allocation5 + $0x154] sm:$0xf] }
  0x50   :  { %2026 = vmatpush.bf16.msk.msrb.mxu2 %vm2025_vm7, %v2287_v28  ;;  %vm2043_vm7 = vmpackc.low %vm209_vm4, %vm208_vm2  ;;  %vm223_vm2 = vcmp.eq.s32.totalorder %v126_v33, %v2327_v23  ;;  %vm238_vm4 = vcmp.eq.s32.totalorder %v141_v34, %v2327_v23  ;;  %v1775_v33 = vld [vmem:[#allocation5 + $0x168] sm:$0xf0]  ;;  %v1774_v35 = vor.u32 %v2128_v31, %v1773_v30 }
  0x51   :  { %2042 = vmatpush.bf16.msk.msrb.mxu3 %vm2041_vm11, %v2287_v28  ;;  %vm2075_vm11 = vmpackc.low %vm241_vm10, %vm240_vm8  ;;  %vm188_vm8 = vcmp.eq.s32.totalorder %v91_v48, %v2327_v23  ;;  %vm204_vm10 = vcmp.eq.s32.totalorder %v107_v50, %v2327_v23 }
  0x52   :  { %2058 = vmatpush.bf16.msk.msrb.mxu0 %vm2057_vm13, %v2287_v28  ;;  %2074 = vmatpush.bf16.msk.msrb.mxu1 %vm2073_vm15, %v2287_v28  ;;  %vm191_vm13 = vcmp.eq.s32.totalorder %v94_v29, %v2327_v23  ;;  %vm2061_vm5 = vmpackc.low %vm223_vm2, %vm222_vm1  ;;  %vm237_vm2 = vcmp.eq.s32.totalorder %v140_v55, %v2327_v23  ;;  %v2173_v29 = vld [vmem:[#allocation5 + $0x2d4] sm:$0xf] }
  0x53   :  { %1023 = vmatmul.bf16.gmra.mxu2 %v1822_v43  ;;  %983 = vmatmul.bf16.gmra.mxu0 %v1630_v44  ;;  %vm2029_vm15 = vmpackc.low %vm191_vm13, %vm190_vm12  ;;  %v1703_v43 = vld [vmem:[#allocation5 + $0xd8] sm:$0xf0]  ;;  %v1894_v44 = vor.u32 %v2158_v37, %v1893_v36  ;;  %vm205_vm12 = vcmp.eq.s32.totalorder %v108_v51, %v2327_v23  ;;  %vm220_vm13 = vcmp.eq.s32.totalorder %v123_v52, %v2327_v23 }
  0x54   :  { %1112 = vmatmul.bf16.gmra.mxu3 %v1826_v45  ;;  %2028 = vmatpush.bf16.msk.msrb.mxu2 %vm2027_vm3, %v2287_v28  ;;  %vm2045_vm3 = vmpackc.low %vm207_vm0, %vm206_vm14  ;;  %v1702_v45 = vor.u32 %v2110_v40, %v1701_v39  ;;  %v1706_v47 = vor.u32 %v2107_v42, %v1703_v43  ;;  %vm221_vm14 = vcmp.eq.s32.totalorder %v124_v53, %v2327_v23  ;;  %v2087_v39 = vld [vmem:[#allocation5 + $0x1c] sm:$0xf0]  ;;  %v2084_v40 = vld [vmem:[#allocation5 + $0xc] sm:$0xf] }
  0x55   :  { %1072 = vmatmul.bf16.gmra.mxu1 %v1634_v46  ;;  %2044 = vmatpush.bf16.msk.msrb.mxu3 %vm2043_vm7, %v2287_v28  ;;  %vm2077_vm7 = vmpackc.low %vm239_vm6, %vm238_vm4  ;;  %v1898_v46 = vor.u32 %v2155_v38, %v1895_v41  ;;  %vm236_vm0 = vcmp.eq.s32.totalorder %v139_v54, %v2327_v23  ;;  %vm186_vm4 = vcmp.eq.s32.totalorder %v89_v6, %v2327_v23  ;;  %v1613_v38 = vld [vmem:[#allocation5 + $0x8] sm:$0xf]  ;;  %v1621_v41 = vld [vmem:[#allocation5 + $0x10] sm:$0xf] }
  0x56   :  { %2060 = vmatpush.bf16.msk.msrb.mxu0 %vm2059_vm9, %v2287_v28  ;;  %2076 = vmatpush.bf16.msk.msrb.mxu1 %vm2075_vm11, %v2287_v28  ;;  %vm189_vm9 = vcmp.eq.s32.totalorder %v92_v49, %v2327_v23  ;;  %vm2063_vm1 = vmpackc.low %vm221_vm14, %vm220_vm13  ;;  %vm202_vm6 = vcmp.eq.s32.totalorder %v105_v8, %v2327_v23  ;;  %vm235_vm14 = vcmp.eq.s32.totalorder %v138_v14, %v2327_v23  ;;  %v2088_v42 = vld [vmem:[#allocation5 + $0x24] sm:$0xf0]  ;;  %v1615_v43 = vld [vmem:[#allocation5 + $0x20] sm:$0xf0] }
  0x57   :  { %vm2031_vm11 = vmpackc.low %vm189_vm9, %vm188_vm8  ;;  %vm203_vm8 = vcmp.eq.s32.totalorder %v106_v9, %v2327_v23  ;;  %vm218_vm9 = vcmp.eq.s32.totalorder %v121_v11, %v2327_v23  ;;  %v1778_v37 = vor.u32 %v2125_v32, %v1775_v33  ;;  %v1618_v49 = vor.u32 %v2084_v40, %v1615_v43 }
  0x58   :  { %2030 = vmatpush.bf16.msk.msrb.mxu2 %vm2029_vm15, %v2287_v28  ;;  %vm2047_vm15 = vmpackc.low %vm205_vm12, %vm204_vm10  ;;  %vm219_vm10 = vcmp.eq.s32.totalorder %v122_v12, %v2327_v23  ;;  %vm234_vm12 = vcmp.eq.s32.totalorder %v137_v13, %v2327_v23 }
  0x59   :  { %2046 = vmatpush.bf16.msk.msrb.mxu3 %vm2045_vm3, %v2287_v28  ;;  %vm2079_vm3 = vmpackc.low %vm237_vm2, %vm236_vm0 }
  0x5a   :  { %2062 = vmatpush.bf16.msk.msrb.mxu0 %vm2061_vm5, %v2287_v28  ;;  %2078 = vmatpush.bf16.msk.msrb.mxu1 %vm2077_vm7, %v2287_v28  ;;  %vm187_vm5 = vcmp.eq.s32.totalorder %v90_v7, %v2327_v23  ;;  %vm2065_vm13 = vmpackc.low %vm219_vm10, %vm218_vm9  ;;  %v1965_v23 = vld [vmem:[#allocation5 + $0x2d0] sm:$0xf] }
  0x5b   :  { %vm2033_vm7 = vmpackc.low %vm187_vm5, %vm186_vm4  ;;  %v1966_v34 = vor.u32 %v2176_v27, %v1965_v23  ;;  %v1663_v23 = vld [vmem:[#allocation5 + $0x80] sm:$0xf0]  ;;  %v2097_v27 = vld [vmem:[#allocation5 + $0x74] sm:$0xf] }
  0x5c   :  { %2032 = vmatpush.bf16.msk.msrb.mxu2 %vm2031_vm11, %v2287_v28  ;;  %vm2049_vm11 = vmpackc.low %vm203_vm8, %vm202_vm6 }
  0x5d   :  { %2048 = vmatpush.bf16.msk.msrb.mxu3 %vm2047_vm15, %v2287_v28  ;;  %vm2081_vm15 = vmpackc.low %vm235_vm14, %vm234_vm12 }
  0x5e   :  { %2064 = vmatpush.bf16.msk.msrb.mxu0 %vm2063_vm1, %v2287_v28  ;;  %2080 = vmatpush.bf16.msk.msrb.mxu1 %vm2079_vm3, %v2287_v28 }
  0x60   :  { %2034 = vmatpush.bf16.msk.msrb.mxu2 %vm2033_vm7, %v2287_v28 }
  0x61   :  { %2050 = vmatpush.bf16.msk.msrb.mxu3 %vm2049_vm11, %v2287_v28 }
  0x62   :  { %2066 = vmatpush.bf16.msk.msrb.mxu0 %vm2065_vm13, %v2287_v28  ;;  %2082 = vmatpush.bf16.msk.msrb.mxu1 %vm2081_vm15, %v2287_v28  ;;  %v1967_v28 = vld [vmem:[#allocation5 + $0x2e8] sm:$0xf0] }
  0x63   :  { %1028 = vmatmul.bf16.gmra.mxu2 %v1846_v63  ;;  %988 = vmatmul.bf16.gmra.mxu0 %v1654_v0  ;;  %v1727_v63 = vld [vmem:[#allocation5 + $0x108] sm:$0xf0]  ;;  %v1918_v0 = vor.u32 %v2164_v57, %v1917_v56  ;;  %v1970_v36 = vor.u32 %v2173_v29, %v1967_v28 }
  0x64   :  { %1117 = vmatmul.bf16.gmra.mxu3 %v1850_v1  ;;  %v1726_v1 = vor.u32 %v2116_v60, %v1725_v59  ;;  %v1730_v3 = vor.u32 %v2113_v62, %v1727_v63  ;;  %v1637_v59 = vld [vmem:[#allocation5 + $0x38] sm:$0xf]  ;;  %v2093_v60 = vld [vmem:[#allocation5 + $0x4c] sm:$0xf0]  ;;  %v1645_v62 = vld [vmem:[#allocation5 + $0x40] sm:$0xf] }
  0x65   :  { %1077 = vmatmul.bf16.gmra.mxu1 %v1658_v2  ;;  %v1922_v2 = vor.u32 %v2161_v58, %v1919_v61  ;;  %v2090_v61 = vld [vmem:[#allocation5 + $0x3c] sm:$0xf]  ;;  %v2094_v63 = vld [vmem:[#allocation5 + $0x54] sm:$0xf0]  ;;  %v1638_v7 = vor.u32 %v2093_v60, %v1637_v59  ;;  %v1671_v29 = vld [vmem:[#allocation5 + $0x88] sm:$0xf0] }
  0x66   :  { %v1646_v8 = vor.u32 %v2094_v63, %v1645_v62 }
  0x73   :  { %1033 = vmatmul.bf16.gmra.mxu2 %v1870_v22  ;;  %993 = vmatmul.bf16.gmra.mxu0 %v1678_v24  ;;  %v1942_v22 = vor.u32 %v2170_v16, %v1941_v15  ;;  %v1750_v24 = vor.u32 %v2122_v10, %v1749_v18 }
  0x74   :  { %1122 = vmatmul.bf16.gmra.mxu3 %v1874_v25  ;;  %v1946_v25 = vor.u32 %v2167_v17, %v1943_v19 }
  0x75   :  { %1082 = vmatmul.bf16.gmra.mxu1 %v1682_v26  ;;  %v1754_v26 = vor.u32 %v2119_v20, %v1751_v21  ;;  %v1661_v21 = vld [vmem:[#allocation5 + $0x68] sm:$0xf] }
  0x83   :  { %1038 = vmatmul.bf16.gmra.mxu2 %v1894_v44  ;;  %998 = vmatmul.bf16.gmra.mxu0 %v1702_v45  ;;  %v2085_v44 = vld [vmem:[#allocation5 + $0x14] sm:$0xf]  ;;  %v1623_v45 = vld [vmem:[#allocation5 + $0x28] sm:$0xf0] }
  0x84   :  { %1127 = vmatmul.bf16.gmra.mxu3 %v1898_v46  ;;  %v1614_v46 = vor.u32 %v2087_v39, %v1613_v38  ;;  %v1626_v50 = vor.u32 %v2085_v44, %v1623_v45  ;;  %v1685_v45 = vld [vmem:[#allocation5 + $0x98] sm:$0xf] }
  0x85   :  { %1087 = vmatmul.bf16.gmra.mxu1 %v1706_v47  ;;  %v1622_v47 = vor.u32 %v2088_v42, %v1621_v41 }
  0x93   :  { %1043 = vmatmul.bf16.gmra.mxu2 %v1918_v0  ;;  %1003 = vmatmul.bf16.gmra.mxu0 %v1726_v1  ;;  %v1639_v0 = vld [vmem:[#allocation5 + $0x50] sm:$0xf0]  ;;  %v2091_v1 = vld [vmem:[#allocation5 + $0x44] sm:$0xf] }
  0x94   :  { %1132 = vmatmul.bf16.gmra.mxu3 %v1922_v2  ;;  %v1647_v2 = vld [vmem:[#allocation5 + $0x58] sm:$0xf0]  ;;  %v1642_v12 = vor.u32 %v2090_v61, %v1639_v0 }
  0x95   :  { %1092 = vmatmul.bf16.gmra.mxu1 %v1730_v3  ;;  %v1650_v13 = vor.u32 %v2091_v1, %v1647_v2 }
  0xa3   :  { %1048 = vmatmul.bf16.gmra.mxu2 %v1942_v22  ;;  %1008 = vmatmul.bf16.gmra.mxu0 %v1750_v24  ;;  %v2099_v22 = vld [vmem:[#allocation5 + $0x7c] sm:$0xf0]  ;;  %v2096_v24 = vld [vmem:[#allocation5 + $0x6c] sm:$0xf] }
  0xa4   :  { %1137 = vmatmul.bf16.gmra.mxu3 %v1946_v25  ;;  %v1669_v25 = vld [vmem:[#allocation5 + $0x70] sm:$0xf]  ;;  %v1662_v28 = vor.u32 %v2099_v22, %v1661_v21  ;;  %v1719_v21 = vld [vmem:[#allocation5 + $0xe8] sm:$0xf0] }
  0xa5   :  { %1097 = vmatmul.bf16.gmra.mxu1 %v1754_v26  ;;  %v2100_v26 = vld [vmem:[#allocation5 + $0x84] sm:$0xf0] }
  0xa6   :  { %v1670_v32 = vor.u32 %v2100_v26, %v1669_v25 }
  0xb3   :  { %1053 = vmatmul.bf16.gmra.mxu2 %v1966_v34  ;;  %1013 = vmatmul.bf16.gmra.mxu0 %v1774_v35  ;;  %v1666_v35 = vor.u32 %v2096_v24, %v1663_v23 }
  0xb4   :  { %1142 = vmatmul.bf16.gmra.mxu3 %v1970_v36  ;;  %v1674_v36 = vor.u32 %v2097_v27, %v1671_v29 }
  0xb5   :  { %1102 = vmatmul.bf16.gmra.mxu1 %v1778_v37 }
  0xc0   :  { %v979_v48 = vpop.f32.mrf.mxu0 }
  0xc2   :  { %v1068_v51 = vpop.f32.mrf.mxu1 }
  0xc3   :  { %v2694_v52 = vadd.f32 %v1068_v51, %v979_v48  ;;  %1156 = vmatmul.bf16.vlgmr.msrb.gmra.mxu2 %v1614_v46  ;;  %1334 = vmatmul.bf16.vlgmr.msrb.gmra.mxu0 %v1622_v47  ;;  %v2105_v46 = vld [vmem:[#allocation5 + $0xac] sm:$0xf0]  ;;  %v2102_v47 = vld [vmem:[#allocation5 + $0x9c] sm:$0xf]  ;;  %v1693_v48 = vld [vmem:[#allocation5 + $0xa0] sm:$0xf] }
  0xc4   :  { %1245 = vmatmul.bf16.vlgmr.msrb.gmra.mxu3 %v1618_v49  ;;  %v2106_v49 = vld [vmem:[#allocation5 + $0xb4] sm:$0xf0]  ;;  %v2103_v51 = vld [vmem:[#allocation5 + $0xa4] sm:$0xf] }
  0xc5   :  { %1423 = vmatmul.bf16.vlgmr.msrb.gmra.mxu1 %v1626_v50  ;;  %v1687_v50 = vld [vmem:[#allocation5 + $0xb0] sm:$0xf0]  ;;  %v1694_v59 = vor.u32 %v2106_v49, %v1693_v48  ;;  %v2115_v48 = vld [vmem:[#allocation5 + $0x104] sm:$0xf]  ;;  %v1743_v49 = vld [vmem:[#allocation5 + $0x118] sm:$0xf0] }
  0xc6   :  { %v1019_v53 = vpop.f32.mrf.mxu2  ;;  %v1690_v62 = vor.u32 %v2102_v47, %v1687_v50  ;;  %v1735_v47 = vld [vmem:[#allocation5 + $0x110] sm:$0xf0] }
  0xc7   :  { %v1108_v54 = vpop.f32.mrf.mxu3 }
  0xc8   :  { %v2696_v55 = vadd.f32 %v1108_v54, %v1019_v53  ;;  %v981_v56 = vpop.f32.mrf.mxu0  ;;  %v1695_v53 = vld [vmem:[#allocation5 + $0xb8] sm:$0xf0] }
  0xc9   :  { %v1698_v63 = vor.u32 %v2103_v51, %v1695_v53 }
  0xca   :  { %v1070_v57 = vpop.f32.mrf.mxu1 }
  0xcb   :  { %v2698_v58 = vadd.f32 %v1070_v57, %v981_v56  ;;  %v1686_v57 = vor.u32 %v2105_v46, %v1685_v45  ;;  %v1741_v45 = vld [vmem:[#allocation5 + $0x100] sm:$0xf]  ;;  %v2118_v46 = vld [vmem:[#allocation5 + $0x114] sm:$0xf0] }
  0xce   :  { %v1021_v3 = vpop.f32.mrf.mxu2 }
  0xcf   :  { %v1110_v6 = vpop.f32.mrf.mxu3 }
  0xd0   :  { %v2700_v9 = vadd.f32 %v1110_v6, %v1021_v3  ;;  %v984_v11 = vpop.f32.mrf.mxu0 }
  0xd2   :  { %v1073_v14 = vpop.f32.mrf.mxu1 }
  0xd3   :  { %v2702_v15 = vadd.f32 %v1073_v14, %v984_v11  ;;  %1161 = vmatmul.bf16.gmra.mxu2 %v1638_v7  ;;  %1339 = vmatmul.bf16.gmra.mxu0 %v1646_v8  ;;  %v2108_v14 = vld [vmem:[#allocation5 + $0xcc] sm:$0xf] }
  0xd4   :  { %1250 = vmatmul.bf16.gmra.mxu3 %v1642_v12  ;;  %v1709_v12 = vld [vmem:[#allocation5 + $0xc8] sm:$0xf] }
  0xd5   :  { %1428 = vmatmul.bf16.gmra.mxu1 %v1650_v13  ;;  %v2111_v13 = vld [vmem:[#allocation5 + $0xdc] sm:$0xf0] }
  0xd6   :  { %v1024_v16 = vpop.f32.mrf.mxu2  ;;  %v1710_v25 = vor.u32 %v2111_v13, %v1709_v12  ;;  %v1757_v13 = vld [vmem:[#allocation5 + $0x128] sm:$0xf] }
  0xd7   :  { %v1113_v17 = vpop.f32.mrf.mxu3 }
  0xd8   :  { %v2704_v18 = vadd.f32 %v1113_v17, %v1024_v16  ;;  %v986_v10 = vpop.f32.mrf.mxu0  ;;  %v1717_v16 = vld [vmem:[#allocation5 + $0xd0] sm:$0xf]  ;;  %v2112_v17 = vld [vmem:[#allocation5 + $0xe4] sm:$0xf0] }
  0xd9   :  { %v1718_v26 = vor.u32 %v2112_v17, %v1717_v16  ;;  %v2120_v16 = vld [vmem:[#allocation5 + $0x12c] sm:$0xf]  ;;  %v1765_v17 = vld [vmem:[#allocation5 + $0x130] sm:$0xf] }
  0xda   :  { %v1075_v19 = vpop.f32.mrf.mxu1 }
  0xdb   :  { %v2706_v20 = vadd.f32 %v1075_v19, %v986_v10  ;;  %v1711_v10 = vld [vmem:[#allocation5 + $0xe0] sm:$0xf0]  ;;  %v2109_v19 = vld [vmem:[#allocation5 + $0xd4] sm:$0xf] }
  0xdc   :  { %v1714_v29 = vor.u32 %v2108_v14, %v1711_v10  ;;  %v2123_v14 = vld [vmem:[#allocation5 + $0x13c] sm:$0xf0]  ;;  %v2124_v10 = vld [vmem:[#allocation5 + $0x144] sm:$0xf0] }
  0xde   :  { %v1026_v30 = vpop.f32.mrf.mxu2 }
  0xdf   :  { %v1115_v31 = vpop.f32.mrf.mxu3 }
  0xe0   :  { %v2708_v33 = vadd.f32 %v1115_v31, %v1026_v30  ;;  %v989_v34 = vpop.f32.mrf.mxu0  ;;  %v1722_v30 = vor.u32 %v2109_v19, %v1719_v21  ;;  %v1759_v19 = vld [vmem:[#allocation5 + $0x140] sm:$0xf0]  ;;  %v2121_v21 = vld [vmem:[#allocation5 + $0x134] sm:$0xf] }
  0xe2   :  { %v1078_v37 = vpop.f32.mrf.mxu1 }
  0xe3   :  { %v2710_v38 = vadd.f32 %v1078_v37, %v989_v34  ;;  %1166 = vmatmul.bf16.gmra.mxu2 %v1662_v28  ;;  %1344 = vmatmul.bf16.gmra.mxu0 %v1670_v32 }
  0xe4   :  { %1255 = vmatmul.bf16.gmra.mxu3 %v1666_v35 }
  0xe5   :  { %1433 = vmatmul.bf16.gmra.mxu1 %v1674_v36 }
  0xe6   :  { %v1029_v39 = vpop.f32.mrf.mxu2 }
  0xe7   :  { %v1118_v40 = vpop.f32.mrf.mxu3 }
  0xe8   :  { %v2712_v41 = vadd.f32 %v1118_v40, %v1029_v39  ;;  %v991_v42 = vpop.f32.mrf.mxu0  ;;  %v1733_v40 = vld [vmem:[#allocation5 + $0xf8] sm:$0xf] }
  0xea   :  { %v1080_v43 = vpop.f32.mrf.mxu1 }
  0xeb   :  { %v2714_v44 = vadd.f32 %v1080_v43, %v991_v42  ;;  %v2117_v42 = vld [vmem:[#allocation5 + $0x10c] sm:$0xf0]  ;;  %v2114_v43 = vld [vmem:[#allocation5 + $0xfc] sm:$0xf] }
  0xec   :  { %v1734_v53 = vor.u32 %v2117_v42, %v1733_v40 }
  0xee   :  { %v1031_v54 = vpop.f32.mrf.mxu2 }
  0xef   :  { %v1120_v56 = vpop.f32.mrf.mxu3 }
  0xf0   :  { %v2716_v60 = vadd.f32 %v1120_v56, %v1031_v54  ;;  %v994_v61 = vpop.f32.mrf.mxu0  ;;  %v1742_v54 = vor.u32 %v2118_v46, %v1741_v45 }
  0xf2   :  { %v1083_v0 = vpop.f32.mrf.mxu1 }
  0xf3   :  { %v2718_v1 = vadd.f32 %v1083_v0, %v994_v61  ;;  %1171 = vmatmul.bf16.gmra.mxu2 %v1686_v57  ;;  %1349 = vmatmul.bf16.gmra.mxu0 %v1694_v59  ;;  %v1738_v59 = vor.u32 %v2114_v43, %v1735_v47  ;;  %v1746_v61 = vor.u32 %v2115_v48, %v1743_v49  ;;  %v1781_v47 = vld [vmem:[#allocation5 + $0x158] sm:$0xf]  ;;  %v2129_v48 = vld [vmem:[#allocation5 + $0x16c] sm:$0xf0]  ;;  %v2126_v49 = vld [vmem:[#allocation5 + $0x15c] sm:$0xf] }
  0xf4   :  { %1260 = vmatmul.bf16.gmra.mxu3 %v1690_v62 }
  0xf5   :  { %1438 = vmatmul.bf16.gmra.mxu1 %v1698_v63 }
  0xf6   :  { %v1034_v2 = vpop.f32.mrf.mxu2 }
  0xf7   :  { %v1123_v3 = vpop.f32.mrf.mxu3 }
  0xf8   :  { %v2720_v6 = vadd.f32 %v1123_v3, %v1034_v2  ;;  %v996_v7 = vpop.f32.mrf.mxu0 }
  0xfa   :  { %v1085_v8 = vpop.f32.mrf.mxu1 }
  0xfb   :  { %v2722_v11 = vadd.f32 %v1085_v8, %v996_v7 }
  0xfe   :  { %v1036_v22 = vpop.f32.mrf.mxu2 }
  0xff   :  { %v1125_v24 = vpop.f32.mrf.mxu3 }
 0x100   :  { %v2724_v23 = vadd.f32 %v1125_v24, %v1036_v22  ;;  %v999_v27 = vpop.f32.mrf.mxu0  ;;  %v1767_v22 = vld [vmem:[#allocation5 + $0x148] sm:$0xf0] }
 0x102   :  { %v1088_v31 = vpop.f32.mrf.mxu1 }
 0x103   :  { %v2726_v28 = vadd.f32 %v1088_v31, %v999_v27  ;;  %1176 = vmatmul.bf16.gmra.mxu2 %v1710_v25  ;;  %1354 = vmatmul.bf16.gmra.mxu0 %v1718_v26  ;;  %v1758_v26 = vor.u32 %v2123_v14, %v1757_v13  ;;  %v1766_v27 = vor.u32 %v2124_v10, %v1765_v17 }
 0x104   :  { %1265 = vmatmul.bf16.gmra.mxu3 %v1714_v29  ;;  %v1762_v31 = vor.u32 %v2120_v16, %v1759_v19 }
 0x105   :  { %1443 = vmatmul.bf16.gmra.mxu1 %v1722_v30 }
 0x106   :  { %v1039_v32 = vpop.f32.mrf.mxu2 }
 0x107   :  { %v1128_v34 = vpop.f32.mrf.mxu3 }
 0x108   :  { %v2728_v35 = vadd.f32 %v1128_v34, %v1039_v32  ;;  %v1001_v36 = vpop.f32.mrf.mxu0  ;;  %v1770_v32 = vor.u32 %v2121_v21, %v1767_v22 }
 0x10a   :  { %v1090_v37 = vpop.f32.mrf.mxu1 }
 0x10b   :  { %v2730_v39 = vadd.f32 %v1090_v37, %v1001_v36 }
 0x10e   :  { %v1041_v50 = vpop.f32.mrf.mxu2 }
 0x10f   :  { %v1130_v51 = vpop.f32.mrf.mxu3 }
 0x110   :  { %v2732_v56 = vadd.f32 %v1130_v51, %v1041_v50  ;;  %v1004_v57 = vpop.f32.mrf.mxu0  ;;  %v1789_v50 = vld [vmem:[#allocation5 + $0x160] sm:$0xf]  ;;  %v2130_v51 = vld [vmem:[#allocation5 + $0x174] sm:$0xf0] }
 0x112   :  { %v1093_v62 = vpop.f32.mrf.mxu1 }
 0x113   :  { %v2734_v63 = vadd.f32 %v1093_v62, %v1004_v57  ;;  %1181 = vmatmul.bf16.gmra.mxu2 %v1734_v53  ;;  %1359 = vmatmul.bf16.gmra.mxu0 %v1742_v54  ;;  %v1783_v53 = vld [vmem:[#allocation5 + $0x170] sm:$0xf0]  ;;  %v2127_v54 = vld [vmem:[#allocation5 + $0x164] sm:$0xf]  ;;  %v1791_v57 = vld [vmem:[#allocation5 + $0x178] sm:$0xf0]  ;;  %v1782_v62 = vor.u32 %v2129_v48, %v1781_v47 }
 0x114   :  { %1270 = vmatmul.bf16.gmra.mxu3 %v1738_v59  ;;  %v1794_v13 = vor.u32 %v2127_v54, %v1791_v57 }
 0x115   :  { %1448 = vmatmul.bf16.gmra.mxu1 %v1746_v61 }
 0x116   :  { %v1044_v0 = vpop.f32.mrf.mxu2 }
 0x117   :  { %v1133_v2 = vpop.f32.mrf.mxu3 }
 0x118   :  { %v2736_v3 = vadd.f32 %v1133_v2, %v1044_v0  ;;  %v1006_v7 = vpop.f32.mrf.mxu0  ;;  %v1790_v0 = vor.u32 %v2130_v51, %v1789_v50 }
 0x11a   :  { %v1095_v8 = vpop.f32.mrf.mxu1 }
 0x11b   :  { %v2738_v12 = vadd.f32 %v1095_v8, %v1006_v7  ;;  %v1786_v8 = vor.u32 %v2126_v49, %v1783_v53 }
 0x11e   :  { %v1046_v24 = vpop.f32.mrf.mxu2 }
 0x11f   :  { %v1135_v25 = vpop.f32.mrf.mxu3 }
 0x120   :  { %v2740_v29 = vadd.f32 %v1135_v25, %v1046_v24  ;;  %v1009_v30 = vpop.f32.mrf.mxu0  ;;  %v1805_v25 = vld [vmem:[#allocation5 + $0x188] sm:$0xf] }
 0x122   :  { %v1098_v34 = vpop.f32.mrf.mxu1 }
 0x123   :  { %v2742_v36 = vadd.f32 %v1098_v34, %v1009_v30  ;;  %1186 = vmatmul.bf16.gmra.mxu2 %v1758_v26  ;;  %1364 = vmatmul.bf16.gmra.mxu0 %v1766_v27  ;;  %v2135_v26 = vld [vmem:[#allocation5 + $0x19c] sm:$0xf0]  ;;  %v2132_v27 = vld [vmem:[#allocation5 + $0x18c] sm:$0xf]  ;;  %v1813_v30 = vld [vmem:[#allocation5 + $0x190] sm:$0xf] }
 0x124   :  { %1275 = vmatmul.bf16.gmra.mxu3 %v1762_v31  ;;  %v2136_v31 = vld [vmem:[#allocation5 + $0x1a4] sm:$0xf0]  ;;  %v2133_v34 = vld [vmem:[#allocation5 + $0x194] sm:$0xf] }
 0x125   :  { %1453 = vmatmul.bf16.gmra.mxu1 %v1770_v32  ;;  %v1807_v32 = vld [vmem:[#allocation5 + $0x1a0] sm:$0xf0]  ;;  %v1814_v47 = vor.u32 %v2136_v31, %v1813_v30 }
 0x126   :  { %v1049_v37 = vpop.f32.mrf.mxu2  ;;  %v1810_v50 = vor.u32 %v2132_v27, %v1807_v32 }
 0x127   :  { %v1138_v40 = vpop.f32.mrf.mxu3 }
 0x128   :  { %v2744_v42 = vadd.f32 %v1138_v40, %v1049_v37  ;;  %v1011_v43 = vpop.f32.mrf.mxu0  ;;  %v1815_v37 = vld [vmem:[#allocation5 + $0x1a8] sm:$0xf0] }
 0x129   :  { %v1818_v51 = vor.u32 %v2133_v34, %v1815_v37 }
 0x12a   :  { %v1100_v45 = vpop.f32.mrf.mxu1 }
 0x12b   :  { %v2746_v46 = vadd.f32 %v1100_v45, %v1011_v43  ;;  %v1806_v45 = vor.u32 %v2135_v26, %v1805_v25  ;;  %v2139_v25 = vld [vmem:[#allocation5 + $0x1c4] sm:$0xf]  ;;  %v1839_v26 = vld [vmem:[#allocation5 + $0x1d8] sm:$0xf0] }
 0x12e   :  { %v1051_v59 = vpop.f32.mrf.mxu2 }
 0x12f   :  { %v1140_v61 = vpop.f32.mrf.mxu3 }
 0x130   :  { %v2748_v2 = vadd.f32 %v1140_v61, %v1051_v59  ;;  %v1014_v7 = vpop.f32.mrf.mxu0 }
 0x132   :  { %v1103_v14 = vpop.f32.mrf.mxu1 }
 0x133   :  { %v2750_v16 = vadd.f32 %v1103_v14, %v1014_v7  ;;  %1191 = vmatmul.bf16.gmra.mxu2 %v1782_v62  ;;  %1369 = vmatmul.bf16.gmra.mxu0 %v1790_v0  ;;  %v2138_v14 = vld [vmem:[#allocation5 + $0x1bc] sm:$0xf] }
 0x134   :  { %1280 = vmatmul.bf16.gmra.mxu3 %v1786_v8  ;;  %v1829_v8 = vld [vmem:[#allocation5 + $0x1b8] sm:$0xf] }
 0x135   :  { %1458 = vmatmul.bf16.gmra.mxu1 %v1794_v13  ;;  %v2141_v13 = vld [vmem:[#allocation5 + $0x1cc] sm:$0xf0] }
 0x136   :  { %v1054_v17 = vpop.f32.mrf.mxu2 }
 0x137   :  { %v1143_v10 = vpop.f32.mrf.mxu3 }
 0x138   :  { %v2752_v19 = vadd.f32 %v1143_v10, %v1054_v17  ;;  %v1016_v21 = vpop.f32.mrf.mxu0  ;;  %v1837_v17 = vld [vmem:[#allocation5 + $0x1c0] sm:$0xf]  ;;  %v2142_v10 = vld [vmem:[#allocation5 + $0x1d4] sm:$0xf0] }
 0x139   :  { %v1838_v32 = vor.u32 %v2142_v10, %v1837_v17  ;;  %v1855_v17 = vld [vmem:[#allocation5 + $0x200] sm:$0xf0]  ;;  %v2145_v10 = vld [vmem:[#allocation5 + $0x1f4] sm:$0xf] }
 0x13a   :  { %v1105_v22 = vpop.f32.mrf.mxu1 }
 0x13b   :  { %v2754_v24 = vadd.f32 %v1105_v22, %v1016_v21  ;;  %v1831_v22 = vld [vmem:[#allocation5 + $0x1d0] sm:$0xf0] }
 0x13c   :  { %v1834_v37 = vor.u32 %v2138_v14, %v1831_v22  ;;  %v2148_v14 = vld [vmem:[#allocation5 + $0x204] sm:$0xf0]  ;;  %v1863_v22 = vld [vmem:[#allocation5 + $0x208] sm:$0xf0] }
 0x13e   :  { %v1056_v40 = vpop.f32.mrf.mxu2 }
 0x13f   :  { %v1145_v43 = vpop.f32.mrf.mxu3 }
 0x140   :  { %v2756_v48 = vadd.f32 %v1145_v43, %v1056_v40  ;;  %v1335_v49 = vpop.f32.mrf.mxu0  ;;  %v1842_v40 = vor.u32 %v2139_v25, %v1839_v26 }
 0x142   :  { %v1424_v53 = vpop.f32.mrf.mxu1 }
 0x143   :  { %1196 = vmatmul.bf16.gmra.mxu2 %v1806_v45  ;;  %1374 = vmatmul.bf16.gmra.mxu0 %v1814_v47 }
 0x144   :  { %1285 = vmatmul.bf16.gmra.mxu3 %v1810_v50 }
 0x145   :  { %1463 = vmatmul.bf16.gmra.mxu1 %v1818_v51 }
 0x146   :  { %v1157_v54 = vpop.f32.mrf.mxu2 }
 0x147   :  { %v1158_v57 = vadd.f32 %v1157_v54, %v2694_v52  ;;  %v1246_v59 = vpop.f32.mrf.mxu3  ;;  %v1830_v52 = vor.u32 %v2141_v13, %v1829_v8  ;;  %v2144_v8 = vld [vmem:[#allocation5 + $0x1ec] sm:$0xf]  ;;  %v1861_v13 = vld [vmem:[#allocation5 + $0x1f0] sm:$0xf] }
 0x148   :  { %v1337_v61 = vpop.f32.mrf.mxu0 }
 0x149   :  { %v1247_v62 = vadd.f32 %v1246_v59, %v1158_v57 }
 0x14a   :  { %v1426_v0 = vpop.f32.mrf.mxu1 }
 0x14b   :  { %v1336_v7 = vadd.f32 %v1335_v49, %v1247_v62  ;;  %v1853_v62 = vld [vmem:[#allocation5 + $0x1e8] sm:$0xf] }
 0x14d   :  { %v2759_v21 = vadd.f32 %v1424_v53, %v1336_v7  ;;  %v2147_v7 = vld [vmem:[#allocation5 + $0x1fc] sm:$0xf0] }
 0x14e   :  { %v1159_v27 = vpop.f32.mrf.mxu2 }
 0x14f   :  { %v1160_v30 = vadd.f32 %v1159_v27, %v2698_v58  ;;  %v1248_v31 = vpop.f32.mrf.mxu3  ;;  %v1862_v27 = vor.u32 %v2148_v14, %v1861_v13  ;;  %v1879_v13 = vld [vmem:[#allocation5 + $0x230] sm:$0xf0]  ;;  %v2151_v14 = vld [vmem:[#allocation5 + $0x224] sm:$0xf] }
 0x150   :  { %v1340_v34 = vpop.f32.mrf.mxu0 }
 0x151   :  { %v1249_v43 = vadd.f32 %v1248_v31, %v1160_v30  ;;  %v1858_v31 = vor.u32 %v2144_v8, %v1855_v17  ;;  %v2154_v8 = vld [vmem:[#allocation5 + $0x234] sm:$0xf0]  ;;  %v1887_v17 = vld [vmem:[#allocation5 + $0x238] sm:$0xf0] }
 0x152   :  { %v1429_v45 = vpop.f32.mrf.mxu1 }
 0x153   :  { %v1338_v47 = vadd.f32 %v1337_v61, %v1249_v43  ;;  %1201 = vmatmul.bf16.gmra.mxu2 %v1830_v52  ;;  %1379 = vmatmul.bf16.gmra.mxu0 %v1838_v32  ;;  %v1866_v52 = vor.u32 %v2145_v10, %v1863_v22 }
 0x154   :  { %1290 = vmatmul.bf16.gmra.mxu3 %v1834_v37 }
 0x155   :  { %1468 = vmatmul.bf16.gmra.mxu1 %v1842_v40  ;;  %v2762_v49 = vadd.f32 %v1426_v0, %v1338_v47 }
 0x156   :  { %v1162_v50 = vpop.f32.mrf.mxu2 }
 0x157   :  { %v1163_v51 = vadd.f32 %v1162_v50, %v2702_v15  ;;  %v1251_v53 = vpop.f32.mrf.mxu3  ;;  %v1854_v15 = vor.u32 %v2147_v7, %v1853_v62  ;;  %v2150_v62 = vld [vmem:[#allocation5 + $0x21c] sm:$0xf]  ;;  %v1885_v7 = vld [vmem:[#allocation5 + $0x220] sm:$0xf] }
 0x158   :  { %v1342_v58 = vpop.f32.mrf.mxu0 }
 0x159   :  { %v1252_v54 = vadd.f32 %v1251_v53, %v1163_v51 }
 0x15a   :  { %v1431_v57 = vpop.f32.mrf.mxu1 }
 0x15b   :  { %v1341_v59 = vadd.f32 %v1340_v34, %v1252_v54  ;;  %v1877_v54 = vld [vmem:[#allocation5 + $0x218] sm:$0xf] }
 0x15d   :  { %v2765_v61 = vadd.f32 %v1429_v45, %v1341_v59  ;;  %v2153_v59 = vld [vmem:[#allocation5 + $0x22c] sm:$0xf0] }
 0x15e   :  { %v1164_v0 = vpop.f32.mrf.mxu2 }
 0x15f   :  { %v1165_v25 = vadd.f32 %v1164_v0, %v2706_v20  ;;  %v1253_v26 = vpop.f32.mrf.mxu3  ;;  %v1886_v0 = vor.u32 %v2154_v8, %v1885_v7  ;;  %v1903_v7 = vld [vmem:[#allocation5 + $0x260] sm:$0xf0]  ;;  %v2157_v8 = vld [vmem:[#allocation5 + $0x254] sm:$0xf] }
 0x160   :  { %v1345_v30 = vpop.f32.mrf.mxu0 }
 0x161   :  { %v1254_v32 = vadd.f32 %v1253_v26, %v1165_v25  ;;  %v1882_v26 = vor.u32 %v2150_v62, %v1879_v13  ;;  %v2160_v62 = vld [vmem:[#allocation5 + $0x264] sm:$0xf0]  ;;  %v1911_v13 = vld [vmem:[#allocation5 + $0x268] sm:$0xf0] }
 0x162   :  { %v1434_v34 = vpop.f32.mrf.mxu1 }
 0x163   :  { %v1343_v37 = vadd.f32 %v1342_v58, %v1254_v32  ;;  %1206 = vmatmul.bf16.gmra.mxu2 %v1854_v15  ;;  %1384 = vmatmul.bf16.gmra.mxu0 %v1862_v27  ;;  %v1890_v15 = vor.u32 %v2151_v14, %v1887_v17 }
 0x164   :  { %1295 = vmatmul.bf16.gmra.mxu3 %v1858_v31 }
 0x165   :  { %1473 = vmatmul.bf16.gmra.mxu1 %v1866_v52  ;;  %v2768_v40 = vadd.f32 %v1431_v57, %v1343_v37 }
 0x166   :  { %v1167_v43 = vpop.f32.mrf.mxu2 }
 0x167   :  { %v1168_v45 = vadd.f32 %v1167_v43, %v2710_v38  ;;  %v1256_v47 = vpop.f32.mrf.mxu3  ;;  %v1878_v38 = vor.u32 %v2153_v59, %v1877_v54  ;;  %v2156_v54 = vld [vmem:[#allocation5 + $0x24c] sm:$0xf]  ;;  %v1909_v59 = vld [vmem:[#allocation5 + $0x250] sm:$0xf] }
 0x168   :  { %v1347_v20 = vpop.f32.mrf.mxu0 }
 0x169   :  { %v1257_v50 = vadd.f32 %v1256_v47, %v1168_v45 }
 0x16a   :  { %v1436_v51 = vpop.f32.mrf.mxu1 }
 0x16b   :  { %v1346_v53 = vadd.f32 %v1345_v30, %v1257_v50  ;;  %v1901_v50 = vld [vmem:[#allocation5 + $0x248] sm:$0xf] }
 0x16d   :  { %v2771_v58 = vadd.f32 %v1434_v34, %v1346_v53  ;;  %v2159_v53 = vld [vmem:[#allocation5 + $0x25c] sm:$0xf0] }
 0x16e   :  { %v1169_v57 = vpop.f32.mrf.mxu2 }
 0x16f   :  { %v1170_v10 = vadd.f32 %v1169_v57, %v2714_v44  ;;  %v1258_v22 = vpop.f32.mrf.mxu3  ;;  %v1910_v57 = vor.u32 %v2160_v62, %v1909_v59  ;;  %v1927_v59 = vld [vmem:[#allocation5 + $0x290] sm:$0xf0]  ;;  %v2163_v62 = vld [vmem:[#allocation5 + $0x284] sm:$0xf] }
 0x170   :  { %v1350_v25 = vpop.f32.mrf.mxu0 }
 0x171   :  { %v1259_v27 = vadd.f32 %v1258_v22, %v1170_v10  ;;  %v1906_v22 = vor.u32 %v2156_v54, %v1903_v7  ;;  %v2166_v54 = vld [vmem:[#allocation5 + $0x294] sm:$0xf0]  ;;  %v1935_v7 = vld [vmem:[#allocation5 + $0x298] sm:$0xf0] }
 0x172   :  { %v1439_v30 = vpop.f32.mrf.mxu1 }
 0x173   :  { %v1348_v31 = vadd.f32 %v1347_v20, %v1259_v27  ;;  %1211 = vmatmul.bf16.gmra.mxu2 %v1878_v38  ;;  %1389 = vmatmul.bf16.gmra.mxu0 %v1886_v0  ;;  %v1914_v38 = vor.u32 %v2157_v8, %v1911_v13 }
 0x174   :  { %1300 = vmatmul.bf16.gmra.mxu3 %v1882_v26 }
 0x175   :  { %1478 = vmatmul.bf16.gmra.mxu1 %v1890_v15  ;;  %v2774_v52 = vadd.f32 %v1436_v51, %v1348_v31 }
 0x176   :  { %v1172_v32 = vpop.f32.mrf.mxu2 }
 0x177   :  { %v1173_v34 = vadd.f32 %v1172_v32, %v2718_v1  ;;  %v1261_v37 = vpop.f32.mrf.mxu3  ;;  %v1902_v1 = vor.u32 %v2159_v53, %v1901_v50  ;;  %v2162_v50 = vld [vmem:[#allocation5 + $0x27c] sm:$0xf]  ;;  %v1933_v53 = vld [vmem:[#allocation5 + $0x280] sm:$0xf] }
 0x178   :  { %v1352_v44 = vpop.f32.mrf.mxu0 }
 0x179   :  { %v1262_v43 = vadd.f32 %v1261_v37, %v1173_v34 }
 0x17a   :  { %v1441_v45 = vpop.f32.mrf.mxu1 }
 0x17b   :  { %v1351_v47 = vadd.f32 %v1350_v25, %v1262_v43  ;;  %v1925_v43 = vld [vmem:[#allocation5 + $0x278] sm:$0xf] }
 0x17d   :  { %v2777_v20 = vadd.f32 %v1439_v30, %v1351_v47  ;;  %v2165_v47 = vld [vmem:[#allocation5 + $0x28c] sm:$0xf0] }
 0x17e   :  { %v1174_v51 = vpop.f32.mrf.mxu2 }
 0x17f   :  { %v1175_v14 = vadd.f32 %v1174_v51, %v2722_v11  ;;  %v1263_v17 = vpop.f32.mrf.mxu3  ;;  %v1934_v51 = vor.u32 %v2166_v54, %v1933_v53  ;;  %v1951_v53 = vld [vmem:[#allocation5 + $0x2c0] sm:$0xf0]  ;;  %v2169_v54 = vld [vmem:[#allocation5 + $0x2b4] sm:$0xf] }
 0x180   :  { %v1355_v10 = vpop.f32.mrf.mxu0 }
 0x181   :  { %v1264_v0 = vadd.f32 %v1263_v17, %v1175_v14  ;;  %v1930_v17 = vor.u32 %v2162_v50, %v1927_v59  ;;  %v2172_v50 = vld [vmem:[#allocation5 + $0x2c4] sm:$0xf0]  ;;  %v1959_v59 = vld [vmem:[#allocation5 + $0x2c8] sm:$0xf0] }
 0x182   :  { %v1444_v25 = vpop.f32.mrf.mxu1 }
 0x183   :  { %v1353_v26 = vadd.f32 %v1352_v44, %v1264_v0  ;;  %1216 = vmatmul.bf16.gmra.mxu2 %v1902_v1  ;;  %1394 = vmatmul.bf16.gmra.mxu0 %v1910_v57  ;;  %v1938_v1 = vor.u32 %v2163_v62, %v1935_v7 }
 0x184   :  { %1305 = vmatmul.bf16.gmra.mxu3 %v1906_v22 }
 0x185   :  { %1483 = vmatmul.bf16.gmra.mxu1 %v1914_v38  ;;  %v2780_v15 = vadd.f32 %v1441_v45, %v1353_v26 }
 0x186   :  { %v1177_v27 = vpop.f32.mrf.mxu2 }
 0x187   :  { %v1178_v30 = vadd.f32 %v1177_v27, %v2726_v28  ;;  %v1266_v31 = vpop.f32.mrf.mxu3  ;;  %v1926_v28 = vor.u32 %v2165_v47, %v1925_v43  ;;  %v2168_v43 = vld [vmem:[#allocation5 + $0x2ac] sm:$0xf]  ;;  %v1957_v47 = vld [vmem:[#allocation5 + $0x2b0] sm:$0xf] }
 0x188   :  { %v1357_v11 = vpop.f32.mrf.mxu0 }
 0x189   :  { %v1267_v32 = vadd.f32 %v1266_v31, %v1178_v30 }
 0x18a   :  { %v1446_v34 = vpop.f32.mrf.mxu1 }
 0x18b   :  { %v1356_v37 = vadd.f32 %v1355_v10, %v1267_v32  ;;  %v1949_v32 = vld [vmem:[#allocation5 + $0x2a8] sm:$0xf] }
 0x18d   :  { %v2783_v44 = vadd.f32 %v1444_v25, %v1356_v37  ;;  %v2171_v37 = vld [vmem:[#allocation5 + $0x2bc] sm:$0xf0] }
 0x18e   :  { %v1179_v45 = vpop.f32.mrf.mxu2 }
 0x18f   :  { %v1180_v8 = vadd.f32 %v1179_v45, %v2730_v39  ;;  %v1268_v13 = vpop.f32.mrf.mxu3  ;;  %v1958_v45 = vor.u32 %v2172_v50, %v1957_v47  ;;  %v1975_v47 = vld [vmem:[#allocation5 + $0x2f0] sm:$0xf0]  ;;  %v2175_v50 = vld [vmem:[#allocation5 + $0x2e4] sm:$0xf] }
 0x190   :  { %v1360_v14 = vpop.f32.mrf.mxu0 }
 0x191   :  { %v1269_v57 = vadd.f32 %v1268_v13, %v1180_v8  ;;  %v1954_v13 = vor.u32 %v2168_v43, %v1951_v53  ;;  %v2178_v43 = vld [vmem:[#allocation5 + $0x2f4] sm:$0xf0]  ;;  %v1983_v53 = vld [vmem:[#allocation5 + $0x2f8] sm:$0xf0] }
 0x192   :  { %v1449_v10 = vpop.f32.mrf.mxu1 }
 0x193   :  { %v1358_v22 = vadd.f32 %v1357_v11, %v1269_v57  ;;  %1221 = vmatmul.bf16.gmra.mxu2 %v1926_v28  ;;  %1399 = vmatmul.bf16.gmra.mxu0 %v1934_v51  ;;  %v1962_v28 = vor.u32 %v2169_v54, %v1959_v59 }
 0x194   :  { %1310 = vmatmul.bf16.gmra.mxu3 %v1930_v17 }
 0x195   :  { %1488 = vmatmul.bf16.gmra.mxu1 %v1938_v1  ;;  %v2786_v38 = vadd.f32 %v1446_v34, %v1358_v22 }
 0x196   :  { %v1182_v0 = vpop.f32.mrf.mxu2 }
 0x197   :  { %v1183_v25 = vadd.f32 %v1182_v0, %v2734_v63  ;;  %v1271_v26 = vpop.f32.mrf.mxu3  ;;  %v1950_v63 = vor.u32 %v2171_v37, %v1949_v32  ;;  %v2174_v32 = vld [vmem:[#allocation5 + $0x2dc] sm:$0xf]  ;;  %v1981_v37 = vld [vmem:[#allocation5 + $0x2e0] sm:$0xf] }
 0x198   :  { %v1362_v39 = vpop.f32.mrf.mxu0 }
 0x199   :  { %v1272_v27 = vadd.f32 %v1271_v26, %v1183_v25 }
 0x19a   :  { %v1451_v30 = vpop.f32.mrf.mxu1 }
 0x19b   :  { %v1361_v31 = vadd.f32 %v1360_v14, %v1272_v27  ;;  %v1973_v27 = vld [vmem:[#allocation5 + $0x2d8] sm:$0xf] }
 0x19d   :  { %v2789_v11 = vadd.f32 %v1449_v10, %v1361_v31  ;;  %v2177_v31 = vld [vmem:[#allocation5 + $0x2ec] sm:$0xf0] }
 0x19e   :  { %v1184_v34 = vpop.f32.mrf.mxu2 }
 0x19f   :  { %v1185_v62 = vadd.f32 %v1184_v34, %v2738_v12  ;;  %v1273_v7 = vpop.f32.mrf.mxu3  ;;  %v1982_v34 = vor.u32 %v2178_v43, %v1981_v37 }
 0x1a0   :  { %v1365_v8 = vpop.f32.mrf.mxu0 }
 0x1a1   :  { %v1274_v51 = vadd.f32 %v1273_v7, %v1185_v62  ;;  %v1978_v7 = vor.u32 %v2174_v32, %v1975_v47 }
 0x1a2   :  { %v1454_v14 = vpop.f32.mrf.mxu1 }
 0x1a3   :  { %v1363_v17 = vadd.f32 %v1362_v39, %v1274_v51  ;;  %1226 = vmatmul.bf16.gmra.mxu2 %v1950_v63  ;;  %1404 = vmatmul.bf16.gmra.mxu0 %v1958_v45  ;;  %v1986_v63 = vor.u32 %v2175_v50, %v1983_v53 }
 0x1a4   :  { %1315 = vmatmul.bf16.gmra.mxu3 %v1954_v13 }
 0x1a5   :  { %1493 = vmatmul.bf16.gmra.mxu1 %v1962_v28  ;;  %v2792_v1 = vadd.f32 %v1451_v30, %v1363_v17 }
 0x1a6   :  { %v1187_v57 = vpop.f32.mrf.mxu2 }
 0x1a7   :  { %v1188_v10 = vadd.f32 %v1187_v57, %v2742_v36  ;;  %v1276_v22 = vpop.f32.mrf.mxu3  ;;  %v1974_v36 = vor.u32 %v2177_v31, %v1973_v27 }
 0x1a8   :  { %v1367_v12 = vpop.f32.mrf.mxu0 }
 0x1a9   :  { %v1277_v0 = vadd.f32 %v1276_v22, %v1188_v10 }
 0x1aa   :  { %v1456_v25 = vpop.f32.mrf.mxu1 }
 0x1ab   :  { %v1366_v26 = vadd.f32 %v1365_v8, %v1277_v0 }
 0x1ad   :  { %v2795_v39 = vadd.f32 %v1454_v14, %v1366_v26 }
 0x1ae   :  { %v1189_v30 = vpop.f32.mrf.mxu2 }
 0x1af   :  { %v1190_v54 = vadd.f32 %v1189_v30, %v2746_v46  ;;  %v1278_v59 = vpop.f32.mrf.mxu3  ;;  %v2810_v30 = vsub.f32 %v2312_v4, %v47_v5 }
 0x1b0   :  { %v1370_v62 = vpop.f32.mrf.mxu0 }
 0x1b1   :  { %v1279_v45 = vadd.f32 %v1278_v59, %v1190_v54 }
 0x1b2   :  { %v1459_v8 = vpop.f32.mrf.mxu1 }
 0x1b3   :  { %v1368_v13 = vadd.f32 %v1367_v12, %v1279_v45  ;;  %1231 = vmatmul.bf16.gmra.mxu2 %v1974_v36  ;;  %1409 = vmatmul.bf16.gmra.mxu0 %v1982_v34  ;;  %v2813_v34 = vsub.f32 1.0, %v2810_v30 }
 0x1b4   :  { %1320 = vmatmul.bf16.gmra.mxu3 %v1978_v7 }
 0x1b5   :  { %1498 = vmatmul.bf16.gmra.mxu1 %v1986_v63  ;;  %v2798_v28 = vadd.f32 %v1456_v25, %v1368_v13 }
 0x1b6   :  { %v1192_v51 = vpop.f32.mrf.mxu2 }
 0x1b7   :  { %v1193_v14 = vadd.f32 %v1192_v51, %v2750_v16  ;;  %v1281_v17 = vpop.f32.mrf.mxu3 }
 0x1b8   :  { %v1372_v46 = vpop.f32.mrf.mxu0 }
 0x1b9   :  { %v1282_v57 = vadd.f32 %v1281_v17, %v1193_v14  ;;  %v2822_v14 = vrot.slane %v2813_v34, 6 }
 0x1ba   :  { %v1461_v10 = vpop.f32.mrf.mxu1 }
 0x1bb   :  { %v1371_v22 = vadd.f32 %v1370_v62, %v1282_v57 }
 0x1bd   :  { %v2801_v0 = vadd.f32 %v1459_v8, %v1371_v22  ;;  %v1522_v8 = vrot.slane %v2813_v34, 7 }
 0x1be   :  { %v1194_v26 = vpop.f32.mrf.mxu2 }
 0x1bf   :  { %v1195_v27 = vadd.f32 %v1194_v26, %v2754_v24  ;;  %v1283_v12 = vpop.f32.mrf.mxu3  ;;  %v1524_v5 = vmul.f32 %v1522_v8, %v2813_v34 }
 0x1c0   :  { %v1375_v31 = vpop.f32.mrf.mxu0 }
 0x1c1   :  { %v1284_v32 = vadd.f32 %v1283_v12, %v1195_v27  ;;  %v1527_v26 = vmul.f32 %v2822_v14, %v1524_v5 }
 0x1c2   :  { %v1464_v37 = vpop.f32.mrf.mxu1 }
 0x1c3   :  { %v1373_v43 = vadd.f32 %v1372_v46, %v1284_v32  ;;  %v2825_v46 = vrot.slane %v2810_v30, 6 }
 0x1c5   :  { %v2804_v25 = vadd.f32 %v1461_v10, %v1373_v43  ;;  %v1534_v12 = vmul.f32 %v2825_v46, %v1524_v5 }
 0x1c6   :  { %v1197_v47 = vpop.f32.mrf.mxu2 }
 0x1c7   :  { %v1198_v16 = vadd.f32 %v1197_v47, %v2696_v55  ;;  %v1286_v50 = vpop.f32.mrf.mxu3  ;;  %v1535_v47 = vperm.slane %v1534_v12, 2 }
 0x1c8   :  { %v1377_v53 = vpop.f32.mrf.mxu0 }
 0x1c9   :  { %v1287_v54 = vadd.f32 %v1286_v50, %v1198_v16 }
 0x1ca   :  { %v1466_v59 = vpop.f32.mrf.mxu1 }
 0x1cb   :  { %v1376_v24 = vadd.f32 %v1375_v31, %v1287_v54 }
 0x1cd   :  { %v1465_v36 = vadd.f32 %v1464_v37, %v1376_v24  ;;  %v1528_v37 = vperm.slane %v1527_v26, 2 }
 0x1ce   :  { %v1199_v62 = vpop.f32.mrf.mxu2 }
 0x1cf   :  { %v1504_v7 = vadd.f32 %v1465_v36, %v2759_v21  ;;  %v1200_v63 = vadd.f32 %v1199_v62, %v2700_v9  ;;  %v1288_v55 = vpop.f32.mrf.mxu3  ;;  %v1540_v62 = vrot.slane %v2810_v30, 7 }
 0x1d0   :  { %v1380_v45 = vpop.f32.mrf.mxu0 }
 0x1d1   :  { %v1289_v13 = vadd.f32 %v1288_v55, %v1200_v63 }
 0x1d2   :  { %v1469_v51 = vpop.f32.mrf.mxu1 }
 0x1d3   :  { %v1378_v4 = vadd.f32 %v1377_v53, %v1289_v13 }
 0x1d5   :  { %v1467_v17 = vadd.f32 %v1466_v59, %v1378_v4 }
 0x1d6   :  { %v1202_v21 = vpop.f32.mrf.mxu2 }
 0x1d7   :  { %v1505_v9 = vadd.f32 %v1467_v17, %v2762_v49  ;;  %v1203_v57 = vadd.f32 %v1202_v21, %v2704_v18  ;;  %v1291_v10 = vpop.f32.mrf.mxu3  ;;  %v1529_v18 = vmul.f32 %v1528_v37, %v1504_v7 }
 0x1d8   :  { %v1382_v22 = vpop.f32.mrf.mxu0 }
 0x1d9   :  { %v1292_v27 = vadd.f32 %v1291_v10, %v1203_v57  ;;  %v1530_v7 = vmul.f32 %v1528_v37, %v1505_v9 }
 0x1da   :  { %v1471_v31 = vpop.f32.mrf.mxu1 }
 0x1db   :  { %v1381_v32 = vadd.f32 %v1380_v45, %v1292_v27  ;;  %v1542_v45 = vmul.f32 %v1540_v62, %v2813_v34 }
 0x1dd   :  { %v1470_v43 = vadd.f32 %v1469_v51, %v1381_v32  ;;  %v1543_v57 = vmul.f32 %v1542_v45, %v2822_v14 }
 0x1de   :  { %v1204_v16 = vpop.f32.mrf.mxu2 }
 0x1df   :  { %v1506_v50 = vadd.f32 %v1470_v43, %v2765_v61  ;;  %v1205_v53 = vadd.f32 %v1204_v16, %v2708_v33  ;;  %v1293_v49 = vpop.f32.mrf.mxu3  ;;  %v1544_v12 = vperm.slane %v1543_v57, 2 }
 0x1e0   :  { %v1385_v54 = vpop.f32.mrf.mxu0 }
 0x1e1   :  { %v1536_v59 = vmul.f32 %v1535_v47, %v1506_v50  ;;  %v1294_v24 = vadd.f32 %v1293_v49, %v1205_v53 }
 0x1e2   :  { %v1474_v36 = vpop.f32.mrf.mxu1 }
 0x1e3   :  { %v1538_v63 = vadd.f32 %v1536_v59, %v1529_v18  ;;  %v1383_v55 = vadd.f32 %v1382_v22, %v1294_v24 }
 0x1e5   :  { %v1472_v13 = vadd.f32 %v1471_v31, %v1383_v55 }
 0x1e6   :  { %v1207_v51 = vpop.f32.mrf.mxu2 }
 0x1e7   :  { %v1507_v61 = vadd.f32 %v1472_v13, %v2768_v40  ;;  %v1208_v33 = vadd.f32 %v1207_v51, %v2712_v41  ;;  %v1296_v4 = vpop.f32.mrf.mxu3 }
 0x1e8   :  { %v1387_v5 = vpop.f32.mrf.mxu0 }
 0x1e9   :  { %v1537_v17 = vmul.f32 %v1535_v47, %v1507_v61  ;;  %v1297_v21 = vadd.f32 %v1296_v4, %v1208_v33 }
 0x1ea   :  { %v1476_v10 = vpop.f32.mrf.mxu1 }
 0x1eb   :  { %v1539_v26 = vadd.f32 %v1537_v17, %v1530_v7  ;;  %v1386_v22 = vadd.f32 %v1385_v54, %v1297_v21 }
 0x1ed   :  { %v1475_v27 = vadd.f32 %v1474_v36, %v1386_v22 }
 0x1ee   :  { %v1209_v31 = vpop.f32.mrf.mxu2 }
 0x1ef   :  { %v1508_v32 = vadd.f32 %v1475_v27, %v2771_v58  ;;  %v1210_v43 = vadd.f32 %v1209_v31, %v2716_v60  ;;  %v1298_v40 = vpop.f32.mrf.mxu3  ;;  %v1549_v58 = vmul.f32 %v1542_v45, %v2825_v46  ;;  %v1555_v45 = vmul.f32 %v1522_v8, %v2810_v30 }
 0x1f0   :  { %v1390_v16 = vpop.f32.mrf.mxu0 }
 0x1f1   :  { %v1545_v41 = vmul.f32 %v1544_v12, %v1508_v32  ;;  %v1299_v50 = vadd.f32 %v1298_v40, %v1210_v43  ;;  %v1550_v33 = vperm.slane %v1549_v58, 2  ;;  %v1556_v43 = vmul.f32 %v1555_v45, %v2822_v14 }
 0x1f2   :  { %v1479_v53 = vpop.f32.mrf.mxu1 }
 0x1f3   :  { %v1547_v9 = vadd.f32 %v1545_v41, %v1538_v63  ;;  %v1388_v37 = vadd.f32 %v1387_v5, %v1299_v50 }
 0x1f5   :  { %v1477_v47 = vadd.f32 %v1476_v10, %v1388_v37 }
 0x1f6   :  { %v1212_v49 = vpop.f32.mrf.mxu2 }
 0x1f7   :  { %v1509_v18 = vadd.f32 %v1477_v47, %v2774_v52  ;;  %v1213_v54 = vadd.f32 %v1212_v49, %v2720_v6  ;;  %v1301_v59 = vpop.f32.mrf.mxu3 }
 0x1f8   :  { %v1392_v24 = vpop.f32.mrf.mxu0 }
 0x1f9   :  { %v1546_v36 = vmul.f32 %v1544_v12, %v1509_v18  ;;  %v1302_v55 = vadd.f32 %v1301_v59, %v1213_v54 }
 0x1fa   :  { %v1481_v60 = vpop.f32.mrf.mxu1 }
 0x1fb   :  { %v1548_v13 = vadd.f32 %v1546_v36, %v1539_v26  ;;  %v1391_v51 = vadd.f32 %v1390_v16, %v1302_v55 }
 0x1fd   :  { %v1480_v61 = vadd.f32 %v1479_v53, %v1391_v51  ;;  %v1557_v53 = vperm.slane %v1556_v43, 2 }
 0x1fe   :  { %v1214_v4 = vpop.f32.mrf.mxu2 }
 0x1ff   :  { %v1510_v63 = vadd.f32 %v1480_v61, %v2777_v20  ;;  %v1215_v5 = vadd.f32 %v1214_v4, %v2724_v23  ;;  %v1303_v7 = vpop.f32.mrf.mxu3 }
 0x200   :  { %v1395_v52 = vpop.f32.mrf.mxu0 }
 0x201   :  { %v1551_v17 = vmul.f32 %v1550_v33, %v1510_v63  ;;  %v1304_v6 = vadd.f32 %v1303_v7, %v1215_v5 }
 0x202   :  { %v1484_v21 = vpop.f32.mrf.mxu1 }
 0x203   :  { %v1553_v57 = vadd.f32 %v1551_v17, %v1547_v9  ;;  %v1393_v10 = vadd.f32 %v1392_v24, %v1304_v6 }
 0x205   :  { %v1482_v22 = vadd.f32 %v1481_v60, %v1393_v10 }
 0x206   :  { %v1217_v26 = vpop.f32.mrf.mxu2 }
 0x207   :  { %v1511_v27 = vadd.f32 %v1482_v22, %v2780_v15  ;;  %v1218_v12 = vadd.f32 %v1217_v26, %v2728_v35  ;;  %v1306_v20 = vpop.f32.mrf.mxu3  ;;  %v1568_v22 = vmul.f32 %v1540_v62, %v2810_v30 }
 0x208   :  { %v1397_v31 = vpop.f32.mrf.mxu0 }
 0x209   :  { %v1552_v23 = vmul.f32 %v1550_v33, %v1511_v27  ;;  %v1307_v32 = vadd.f32 %v1306_v20, %v1218_v12 }
 0x20a   :  { %v1486_v40 = vpop.f32.mrf.mxu1 }
 0x20b   :  { %v1554_v16 = vadd.f32 %v1552_v23, %v1548_v13  ;;  %v1396_v41 = vadd.f32 %v1395_v52, %v1307_v32 }
 0x20d   :  { %v1485_v50 = vadd.f32 %v1484_v21, %v1396_v41 }
 0x20e   :  { %v1219_v9 = vpop.f32.mrf.mxu2 }
 0x20f   :  { %v1512_v34 = vadd.f32 %v1485_v50, %v2783_v44  ;;  %v1220_v8 = vadd.f32 %v1219_v9, %v2732_v56  ;;  %v1308_v37 = vpop.f32.mrf.mxu3  ;;  %v1562_v44 = vmul.f32 %v1555_v45, %v2825_v46 }
 0x210   :  { %v1400_v15 = vpop.f32.mrf.mxu0 }
 0x211   :  { %v1558_v47 = vmul.f32 %v1557_v53, %v1512_v34  ;;  %v1309_v35 = vadd.f32 %v1308_v37, %v1220_v8  ;;  %v1563_v63 = vperm.slane %v1562_v44, 2 }
 0x212   :  { %v1489_v49 = vpop.f32.mrf.mxu1 }
 0x213   :  { %v1560_v18 = vadd.f32 %v1558_v47, %v1553_v57  ;;  %v1398_v54 = vadd.f32 %v1397_v31, %v1309_v35  ;;  %v1569_v31 = vmul.f32 %v1568_v22, %v2822_v14 }
 0x215   :  { %v1487_v59 = vadd.f32 %v1486_v40, %v1398_v54  ;;  %v1570_v40 = vperm.slane %v1569_v31, 2 }
 0x216   :  { %v1222_v24 = vpop.f32.mrf.mxu2 }
 0x217   :  { %v1513_v36 = vadd.f32 %v1487_v59, %v2786_v38  ;;  %v1223_v55 = vadd.f32 %v1222_v24, %v2736_v3  ;;  %v1311_v58 = vpop.f32.mrf.mxu3 }
 0x218   :  { %v1402_v51 = vpop.f32.mrf.mxu0 }
 0x219   :  { %v1559_v60 = vmul.f32 %v1557_v53, %v1513_v36  ;;  %v1312_v13 = vadd.f32 %v1311_v58, %v1223_v55 }
 0x21a   :  { %v1491_v33 = vpop.f32.mrf.mxu1 }
 0x21b   :  { %v1561_v56 = vadd.f32 %v1559_v60, %v1554_v16  ;;  %v1401_v61 = vadd.f32 %v1400_v15, %v1312_v13 }
 0x21d   :  { %v1490_v4 = vadd.f32 %v1489_v49, %v1401_v61 }
 0x21e   :  { %v1224_v5 = vpop.f32.mrf.mxu2 }
 0x21f   :  { %v1514_v7 = vadd.f32 %v1490_v4, %v2789_v11  ;;  %v1225_v52 = vadd.f32 %v1224_v5, %v2740_v29  ;;  %v1313_v17 = vpop.f32.mrf.mxu3 }
 0x220   :  { %v1405_v57 = vpop.f32.mrf.mxu0 }
 0x221   :  { %v1564_v38 = vmul.f32 %v1563_v63, %v1514_v7  ;;  %v1314_v6 = vadd.f32 %v1313_v17, %v1225_v52 }
 0x222   :  { %v1494_v45 = vpop.f32.mrf.mxu1 }
 0x223   :  { %v1566_v3 = vadd.f32 %v1564_v38, %v1560_v18  ;;  %v1403_v21 = vadd.f32 %v1402_v51, %v1314_v6 }
 0x225   :  { %v1492_v10 = vadd.f32 %v1491_v33, %v1403_v21 }
 0x226   :  { %v1227_v26 = vpop.f32.mrf.mxu2 }
 0x227   :  { %v1515_v27 = vadd.f32 %v1492_v10, %v2792_v1  ;;  %v1228_v12 = vadd.f32 %v1227_v26, %v2744_v42  ;;  %v1316_v11 = vpop.f32.mrf.mxu3 }
 0x228   :  { %v1407_v16 = vpop.f32.mrf.mxu0 }
 0x229   :  { %v1565_v20 = vmul.f32 %v1563_v63, %v1515_v27  ;;  %v1317_v29 = vadd.f32 %v1316_v11, %v1228_v12 }
 0x22a   :  { %v1496_v53 = vpop.f32.mrf.mxu1 }
 0x22b   :  { %v1567_v23 = vadd.f32 %v1565_v20, %v1561_v56  ;;  %v1406_v32 = vadd.f32 %v1405_v57, %v1317_v29 }
 0x22d   :  { %v1495_v43 = vadd.f32 %v1494_v45, %v1406_v32 }
 0x22e   :  { %v1229_v41 = vpop.f32.mrf.mxu2 }
 0x22f   :  { %v1516_v50 = vadd.f32 %v1495_v43, %v2795_v39  ;;  %v1230_v30 = vadd.f32 %v1229_v41, %v2748_v2  ;;  %v1318_v62 = vpop.f32.mrf.mxu3  ;;  %v1575_v39 = vmul.f32 %v1568_v22, %v2825_v46 }
 0x230   :  { %v1410_v35 = vpop.f32.mrf.mxu0 }
 0x231   :  { %v1571_v1 = vmul.f32 %v1570_v40, %v1516_v50  ;;  %v1319_v9 = vadd.f32 %v1318_v62, %v1230_v30  ;;  %v1576_v36 = vperm.slane %v1575_v39, 2 }
 0x232   :  { %v1499_v54 = vpop.f32.mrf.mxu1 }
 0x233   :  { %v1573_v42 = vadd.f32 %v1571_v1, %v1566_v3  ;;  %v1408_v34 = vadd.f32 %v1407_v16, %v1319_v9 }
 0x235   :  { %v1497_v8 = vadd.f32 %v1496_v53, %v1408_v34 }
 0x236   :  { %v1232_v37 = vpop.f32.mrf.mxu2 }
 0x237   :  { %v1517_v14 = vadd.f32 %v1497_v8, %v2798_v28  ;;  %v1233_v15 = vadd.f32 %v1232_v37, %v2752_v19  ;;  %v1321_v47 = vpop.f32.mrf.mxu3 }
 0x238   :  { %v1412_v19 = vpop.f32.mrf.mxu0 }
 0x239   :  { %v1572_v49 = vmul.f32 %v1570_v40, %v1517_v14  ;;  %v1322_v18 = vadd.f32 %v1321_v47, %v1233_v15 }
 0x23a   :  { %v1501_v61 = vpop.f32.mrf.mxu1 }
 0x23b   :  { %v1574_v2 = vadd.f32 %v1572_v49, %v1567_v23  ;;  %v1411_v59 = vadd.f32 %v1410_v35, %v1322_v18 }
 0x23d   :  { %v1500_v24 = vadd.f32 %v1499_v54, %v1411_v59 }
 0x23e   :  { %v1234_v55 = vpop.f32.mrf.mxu2 }
 0x23f   :  { %v1518_v58 = vadd.f32 %v1500_v24, %v2801_v0  ;;  %v1235_v60 = vadd.f32 %v1234_v55, %v2756_v48  ;;  %v1323_v13 = vpop.f32.mrf.mxu3 }
 0x241   :  { %v1577_v28 = vmul.f32 %v1576_v36, %v1518_v58  ;;  %v1324_v44 = vadd.f32 %v1323_v13, %v1235_v60 }
 0x243   :  { %v1579_v51 = vadd.f32 %v1577_v28, %v1573_v42  ;;  %v1413_v56 = vadd.f32 %v1412_v19, %v1324_v44 }
 0x245   :  { %1581 = vst [vmem:[#allocation7] sm:$0xff] %v1579_v51  ;;  %v1502_v33 = vadd.f32 %v1501_v61, %v1413_v56 }
 0x247   :  { %v1519_v46 = vadd.f32 %v1502_v33, %v2804_v25 }
 0x249   :  { %v1578_v0 = vmul.f32 %v1576_v36, %v1519_v46 }
 0x24b   :  { %v1580_v48 = vadd.f32 %v1578_v0, %v1574_v2 }
 0x24d   :  { %1582 = vst [vmem:[#allocation7 + $0x8] sm:$0xff] %v1580_v48 }
 0x24e   :  { %1595 = dma.vmem_to_hbm [thread:$0]  %s1588_s1, 256, %s1590_s23, [#allocation4], %s2289_s24, %s2289_s24, %s2290_s25  }
 0x24f   :  { %2281 = dma.done.wait [#allocation4], 256  }
 0x250   :  { %2282 = vsyncadd [#allocation4], 4294967040 }
 0x251   :  { %1600 = vsyncpa [#allocation3], 1 }
 0x252   :  { %1601 = vsyncpa [#allocation6], 1 }
 0x253   :  { %1602 = vsyncpa [#allocation4], 1 }

</bundles_post_ra>
